<compile_context>
chip_gen: v5e
topology: v5e:2x2
jax: 0.10.0
libtpu: 0.0.40
codegen_flags: <defaults>
</compile_context>

<pallas_src>
import numpy as np

import jax
import jax.numpy as jnp
from jax.experimental import pallas as pl
from jax.experimental.pallas import tpu as pltpu

# ----------------------------- config -------------------------------------
IMG = 16          # input spatial size
IN_CHANS = 4      # input channels
PATCH = 8         # patch size  -> 2x2 = 4 tokens per image
EMBED_DIM = 32    # ViT width
NUM_HEADS = 2
HEAD_DIM = EMBED_DIM // NUM_HEADS
MLP_DIM = 4 * EMBED_DIM
DEPTH = 2         # transformer blocks
OUT_CHANS = 16    # neck output channels
EPS = 1e-6
LANE = 128        # TPU lane width (output padded to this for unmasked stores)
NEG_INF = -1e30   # additive mask value for cross-image attention logits


# ----------------------- host-side constant helpers -------------------------


def _cross_image_mask(B, T):
    """[B*T, B*T] additive mask: 0 within an image, -1e30 across images."""
    m = np.full((B * T, B * T), NEG_INF, np.float32)
    for b in range(B):
        m[b * T:(b + 1) * T, b * T:(b + 1) * T] = 0.0
    return jnp.asarray(m)


def _conv_tap_masks(B, Hp, Wp):
    """[9, B*T, 1] validity masks for the 3x3 conv taps (zero padding), tokens
    flattened row-major over (b, h, w)."""
    T = Hp * Wp
    m = np.zeros((9, B * T, 1), np.float32)
    for kh in range(3):
        for kw in range(3):
            tap = kh * 3 + kw
            for b in range(B):
                for h in range(Hp):
                    for w in range(Wp):
                        hs, ws = h + kh - 1, w + kw - 1
                        if 0 <= hs < Hp and 0 <= ws < Wp:
                            m[tap, b * T + h * Wp + w, 0] = 1.0
    return jnp.asarray(m)


def fold_qk_scale(p):
    """Fold the 1/sqrt(head_dim) attention scale into the Q columns of the qkv
    projection (exact reparameterization, done once host-side)."""
    scale = 1.0 / (HEAD_DIM ** 0.5)
    q = dict(p)
    q["qkv_w"] = p["qkv_w"].at[:, :, :EMBED_DIM].multiply(scale)
    q["qkv_b"] = p["qkv_b"].at[:, :, :EMBED_DIM].multiply(scale)
    return q


# --------------------------- fused Pallas kernel ----------------------------


def sam_feature_extractor_pallas(x, p):
    """x: NCHW [B, C, H, W] -> embeddings NCHW [B, OUT_CHANS, H/PATCH, W/PATCH].
    `p` must already have the q-scale folded (see fold_qk_scale)."""
    B, C, H, W = x.shape
    Hp, Wp = H // PATCH, W // PATCH
    T = Hp * Wp
    BT = B * T
    Cpp = C * PATCH * PATCH
    out_pad = ((OUT_CHANS + LANE - 1) // LANE) * LANE       # lane-dense output width

    # input-side im2col for the patch-embed conv (single relayout of raw image)
    xp = x.reshape(B, C, Hp, PATCH, Wp, PATCH).transpose(0, 2, 4, 1, 3, 5)
    xp = xp.reshape(BT, Cpp)                 # row = (b, hp, wp); col = (c, ph, pw)

    pos_bt = jnp.tile(p["pos_embed"], (B, 1))   # [BT, D] per-image pos embed
    attn_mask = _cross_image_mask(B, T)         # [BT, BT]
    conv_mask = _conv_tap_masks(B, Hp, Wp)      # [9, BT, 1]

    def kernel(x_ref, pos_ref, pw_ref, pb_ref, mask_ref,
               ln1_g_ref, ln1_b_ref, qkv_w_ref, qkv_b_ref,
               proj_w_ref, proj_b_ref, ln2_g_ref, ln2_b_ref,
               mlp_w1_ref, mlp_b1_ref, mlp_w2_ref, mlp_b2_ref,
               nw1_ref, nln1_g_ref, nln1_b_ref,
               nw2_ref, cmask_ref, nln2_g_ref, nln2_b_ref,
               o_ref, attn_ref):
        f32 = jnp.float32

        def ln(h, g, b):
            mu = jnp.mean(h, axis=-1, keepdims=True)
            var = jnp.mean(jnp.square(h - mu), axis=-1, keepdims=True)
            return (h - mu) * jax.lax.rsqrt(var + EPS) * g + b

        # ---- patch embed over all B*T rows at once (full sublane occupancy) ----
        x_all = x_ref[...].astype(f32)                                    # [BT, Cpp]
        tok = jnp.dot(x_all, pw_ref[...], preferred_element_type=f32)
        tok = tok + pb_ref[...] + pos_ref[...]                            # [BT, D]

        mask = mask_ref[...]                                              # [BT, BT]

        # ---- transformer blocks ----
        # TODO(synk): at real DEPTH (12-32) switch to a depth grid axis /
        # fori_loop with per-layer bf16 weight streaming; static unroll is only
        # the right call at this toy DEPTH=2.
        for d in range(DEPTH):
            shortcut = tok
            h = ln(tok, ln1_g_ref[d], ln1_b_ref[d])
            qkv = jnp.dot(h, qkv_w_ref[d], preferred_element_type=f32) + qkv_b_ref[d]

            # Per-head attention over all images at once; cross-image logits are
            # masked to -1e30 (exp -> exactly 0).  1/sqrt(head_dim) is already
            # folded into the Q weights.
            # TODO(synk): at real SAM (T=4096) use windowed / online-softmax
            # attention instead of materializing [BT, BT] scores.
            for hd in range(NUM_HEADS):
                q = qkv[:, hd * HEAD_DIM:(hd + 1) * HEAD_DIM]
                k = qkv[:, EMBED_DIM + hd * HEAD_DIM:EMBED_DIM + (hd + 1) * HEAD_DIM]
                v = qkv[:, 2 * EMBED_DIM + hd * HEAD_DIM:
                        2 * EMBED_DIM + (hd + 1) * HEAD_DIM]
                s = jax.lax.dot_general(
                    q, k, (((1,), (1,)), ((), ())),
                    preferred_element_type=f32)                           # [BT, BT]
                s = s + mask
                s = s - jnp.max(s, axis=-1, keepdims=True)
                e = jnp.exp(s)
                prob = e / jnp.sum(e, axis=-1, keepdims=True)             # exact divide
                # head merge via VMEM scratch (no per-head concatenate relayouts)
                attn_ref[:, hd * HEAD_DIM:(hd + 1) * HEAD_DIM] = jnp.dot(
                    prob, v, preferred_element_type=f32)
            attn = attn_ref[...]                                          # [BT, D]
            tok = shortcut + (
                jnp.dot(attn, proj_w_ref[d], preferred_element_type=f32)
                + proj_b_ref[d])

            h = ln(tok, ln2_g_ref[d], ln2_b_ref[d])
            h = jnp.dot(h, mlp_w1_ref[d], preferred_element_type=f32) + mlp_b1_ref[d]
            # TODO(synk): PyTorch nn.GELU default is exact erf; tanh approx used here.
            h = jax.nn.gelu(h, approximate=True)
            h = jnp.dot(h, mlp_w2_ref[d], preferred_element_type=f32) + mlp_b2_ref[d]
            tok = tok + h

        # ---- neck: 1x1 conv -> LayerNorm2d -> 3x3 conv -> LayerNorm2d ----
        n = jnp.dot(tok, nw1_ref[...], preferred_element_type=f32)        # [BT, OUT]
        n = ln(n, nln1_g_ref[...], nln1_b_ref[...])

        # 3x3 conv (padding=1, no bias) as 9 static sublane rolls + boundary
        # masks + small [BT, OUT] x [OUT, OUT] matmuls.  No [T, T] shift
        # matrices on the MXU; rows that would wrap across image / row
        # boundaries are zeroed by the precomputed per-tap masks.
        acc = jnp.zeros((BT, OUT_CHANS), f32)
        for kh in range(3):
            for kw in range(3):
                tap = kh * 3 + kw
                off = (kh - 1) * Wp + (kw - 1)   # row offset of the source token
                if off == 0:
                    shifted = n
                else:
                    shifted = pltpu.roll(n, shift=(-off) % BT, axis=0)
                shifted = shifted * cmask_ref[tap]
                acc = acc + jnp.dot(shifted, nw2_ref[tap],
                                    preferred_element_type=f32)
        out = ln(acc, nln2_g_ref[...], nln2_b_ref[...])                   # [BT, OUT]

        # lane-dense store: pad OUT_CHANS -> 128 lanes so the store is an
        # unmasked full-width vst; the wrapper slices the pad back off.
        pad = out_pad - OUT_CHANS
        if pad:
            out = jnp.concatenate([out, jnp.zeros((BT, pad), f32)], axis=-1)
        o_ref[...] = out.astype(o_ref.dtype)

    inputs = (
        xp, pos_bt, p["patch_w"], p["patch_b"], attn_mask,
        p["ln1_g"], p["ln1_b"], p["qkv_w"], p["qkv_b"],
        p["proj_w"], p["proj_b"], p["ln2_g"], p["ln2_b"],
        p["mlp_w1"], p["mlp_b1"], p["mlp_w2"], p["mlp_b2"],
        p["neck_w1"], p["neck_ln1_g"], p["neck_ln1_b"],
        p["neck_w2"], conv_mask, p["neck_ln2_g"], p["neck_ln2_b"],
    )

    out = pl.pallas_call(
        kernel,
        out_shape=jax.ShapeDtypeStruct((BT, out_pad), x.dtype),
        # no grid / no BlockSpecs: every (tiny) operand is placed whole in VMEM
        scratch_shapes=[pltpu.VMEM((BT, EMBED_DIM), jnp.float32)],  # attn head merge
    )(*inputs)

    out = out[:, :OUT_CHANS]
    return out.reshape(B, Hp, Wp, OUT_CHANS).transpose(0, 3, 1, 2)   # NCHW


# -------------------------- pure-JAX reference -------------------------------


def _ref_layernorm(x, g, b):
    mu = jnp.mean(x, axis=-1, keepdims=True)
    var = jnp.mean(jnp.square(x - mu), axis=-1, keepdims=True)
    return (x - mu) * jax.lax.rsqrt(var + EPS) * g + b


def sam_feature_extractor_ref(x, p):
    B, C, H, W = x.shape
    Hp, Wp = H // PATCH, W // PATCH
    T = Hp * Wp
    D = EMBED_DIM

    xp = x.reshape(B, C, Hp, PATCH, Wp, PATCH).transpose(0, 2, 4, 1, 3, 5)
    xp = xp.reshape(B * T, C * PATCH * PATCH)
    tok = xp @ p["patch_w"] + p["patch_b"]
    tok = (tok.reshape(B, T, D) + p["pos_embed"][None]).reshape(B * T, D)

    scale = 1.0 / (HEAD_DIM ** 0.5)
    for d in range(DEPTH):
        shortcut = tok
        h = _ref_layernorm(tok, p["ln1_g"][d], p["ln1_b"][d])
        qkv = h @ p["qkv_w"][d] + p["qkv_b"][d]
        qkv = qkv.reshape(B, T, 3, NUM_HEADS, HEAD_DIM)
        q = qkv[:, :, 0].transpose(0, 2, 1, 3)
        k = qkv[:, :, 1].transpose(0, 2, 1, 3)
        v = qkv[:, :, 2].transpose(0, 2, 1, 3)
        s = jnp.einsum("bhqd,bhkd->bhqk", q * scale, k)
        a = jax.nn.softmax(s, axis=-1)
        o = jnp.einsum("bhqk,bhkd->bhqd", a, v)
        o = o.transpose(0, 2, 1, 3).reshape(B * T, D)
        tok = shortcut + o @ p["proj_w"][d] + p["proj_b"][d]

        h = _ref_layernorm(tok, p["ln2_g"][d], p["ln2_b"][d])
        h = jax.nn.gelu(h @ p["mlp_w1"][d] + p["mlp_b1"][d], approximate=True)
        tok = tok + h @ p["mlp_w2"][d] + p["mlp_b2"][d]

    n = tok @ p["neck_w1"]
    n = _ref_layernorm(n, p["neck_ln1_g"], p["neck_ln1_b"])
    nhwc = n.reshape(B, Hp, Wp, OUT_CHANS)
    w_hwio = p["neck_w2"].reshape(3, 3, OUT_CHANS, OUT_CHANS)   # [kh, kw, in, out]
    y = jax.lax.conv_general_dilated(
        nhwc, w_hwio, window_strides=(1, 1), padding="SAME",
        dimension_numbers=("NHWC", "HWIO", "NHWC"))
    y = _ref_layernorm(y.reshape(B * T, OUT_CHANS), p["neck_ln2_g"], p["neck_ln2_b"])
    return y.reshape(B, Hp, Wp, OUT_CHANS).transpose(0, 3, 1, 2)


# ------------------------------ params init ---------------------------------


def init_params(key):
    keys = iter(jax.random.split(key, 64))

    def norm(shape, scale=0.02):
        return scale * jax.random.normal(next(keys), shape, jnp.float32)

    def stack(fn):
        return jnp.stack([fn() for _ in range(DEPTH)], axis=0)

    T = (IMG // PATCH) ** 2
    kin = IN_CHANS * PATCH * PATCH
    p = {}
    # Conv2d weight [D, C, p, p] flattened (c, kh, kw) -> matmul [C*p*p, D]
    p["patch_w"] = norm((EMBED_DIM, IN_CHANS, PATCH, PATCH)).reshape(EMBED_DIM, kin).T
    p["patch_b"] = norm((1, EMBED_DIM))
    p["pos_embed"] = norm((T, EMBED_DIM))

    p["ln1_g"] = jnp.ones((DEPTH, 1, EMBED_DIM), jnp.float32)
    p["ln1_b"] = jnp.zeros((DEPTH, 1, EMBED_DIM), jnp.float32)
    p["qkv_w"] = stack(lambda: norm((EMBED_DIM, 3 * EMBED_DIM)))
    p["qkv_b"] = stack(lambda: norm((1, 3 * EMBED_DIM)))
    p["proj_w"] = stack(lambda: norm((EMBED_DIM, EMBED_DIM)))
    p["proj_b"] = stack(lambda: norm((1, EMBED_DIM)))
    p["ln2_g"] = jnp.ones((DEPTH, 1, EMBED_DIM), jnp.float32)
    p["ln2_b"] = jnp.zeros((DEPTH, 1, EMBED_DIM), jnp.float32)
    p["mlp_w1"] = stack(lambda: norm((EMBED_DIM, MLP_DIM)))
    p["mlp_b1"] = stack(lambda: norm((1, MLP_DIM)))
    p["mlp_w2"] = stack(lambda: norm((MLP_DIM, EMBED_DIM)))
    p["mlp_b2"] = stack(lambda: norm((1, EMBED_DIM)))

    # neck: Conv2d(D, OUT, 1, bias=False) -> [D, OUT]
    p["neck_w1"] = norm((OUT_CHANS, EMBED_DIM)).T
    p["neck_ln1_g"] = jnp.ones((1, OUT_CHANS), jnp.float32)
    p["neck_ln1_b"] = jnp.zeros((1, OUT_CHANS), jnp.float32)
    # Conv2d(OUT, OUT, 3, padding=1, bias=False): torch [out, in, kh, kw]
    #   -> per-tap [9, in, out] for the shifted-matmul formulation
    w2 = norm((OUT_CHANS, OUT_CHANS, 3, 3))
    p["neck_w2"] = w2.transpose(2, 3, 1, 0).reshape(9, OUT_CHANS, OUT_CHANS)
    p["neck_ln2_g"] = jnp.ones((1, OUT_CHANS), jnp.float32)
    p["neck_ln2_b"] = jnp.zeros((1, OUT_CHANS), jnp.float32)
    return p


# --------------------------------- main --------------------------------------

if __name__ == "__main__":
    key = jax.random.PRNGKey(0)
    kx, kp = jax.random.split(key)
    x = jax.random.normal(kx, (2, IN_CHANS, IMG, IMG), jnp.float32)
    params = init_params(kp)
    kernel_params = fold_qk_scale(params)   # q-scale folded into qkv weights (once)

    sam_feature_extractor = jax.jit(
        lambda inp: sam_feature_extractor_pallas(inp, kernel_params))
    out = jax.block_until_ready(sam_feature_extractor(x))

    # pure-JAX reference of the same forward pass (explicit q*scale, lax.conv neck)
    ref = sam_feature_extractor_ref(x, params)

    assert out.shape == (2, OUT_CHANS, IMG // PATCH, IMG // PATCH), out.shape
    assert bool(jnp.all(jnp.isfinite(out)))
    max_err = float(jnp.max(jnp.abs(out - ref)))
    assert bool(jnp.allclose(out, ref, atol=1e-3, rtol=1e-3)), max_err
    print("KERNEL_OK")
</pallas_src>

<mosaic_0001>
module attributes {stable_mosaic.version = 11 : i64} {
  func.func @kernel(%arg0: memref<8x256xf32, #tpu.memory_space<vmem>>, %arg1: memref<8x32xf32, #tpu.memory_space<vmem>>, %arg2: memref<256x32xf32, #tpu.memory_space<vmem>>, %arg3: memref<1x32xf32, #tpu.memory_space<vmem>>, %arg4: memref<8x8xf32, #tpu.memory_space<vmem>>, %arg5: memref<2x1x32xf32, #tpu.memory_space<vmem>>, %arg6: memref<2x1x32xf32, #tpu.memory_space<vmem>>, %arg7: memref<2x32x96xf32, #tpu.memory_space<vmem>>, %arg8: memref<2x1x96xf32, #tpu.memory_space<vmem>>, %arg9: memref<2x32x32xf32, #tpu.memory_space<vmem>>, %arg10: memref<2x1x32xf32, #tpu.memory_space<vmem>>, %arg11: memref<2x1x32xf32, #tpu.memory_space<vmem>>, %arg12: memref<2x1x32xf32, #tpu.memory_space<vmem>>, %arg13: memref<2x32x128xf32, #tpu.memory_space<vmem>>, %arg14: memref<2x1x128xf32, #tpu.memory_space<vmem>>, %arg15: memref<2x128x32xf32, #tpu.memory_space<vmem>>, %arg16: memref<2x1x32xf32, #tpu.memory_space<vmem>>, %arg17: memref<32x16xf32, #tpu.memory_space<vmem>>, %arg18: memref<1x16xf32, #tpu.memory_space<vmem>>, %arg19: memref<1x16xf32, #tpu.memory_space<vmem>>, %arg20: memref<9x16x16xf32, #tpu.memory_space<vmem>>, %arg21: memref<9x8x1xf32, #tpu.memory_space<vmem>>, %arg22: memref<1x16xf32, #tpu.memory_space<vmem>>, %arg23: memref<1x16xf32, #tpu.memory_space<vmem>>, %arg24: memref<8x128xf32, #tpu.memory_space<vmem>>, %arg25: memref<8x32xf32, #tpu.memory_space<vmem>>) attributes {dimension_semantics = [], scalar_prefetch = 0 : i64, scratch_operands = 1 : i64, tpu.core_type = #tpu.core_type<tc>} {
    %c0 = arith.constant 0 : index
    %c0_0 = arith.constant 0 : index
    %0 = vector.load %arg0[%c0, %c0_0] : memref<8x256xf32, #tpu.memory_space<vmem>>, vector<8x256xf32>
    %c0_1 = arith.constant 0 : index
    %c0_2 = arith.constant 0 : index
    %1 = vector.load %arg2[%c0_1, %c0_2] : memref<256x32xf32, #tpu.memory_space<vmem>>, vector<256x32xf32>
    %cst = arith.constant dense<0.000000e+00> : vector<8x32xf32>
    %2 = tpu.matmul %0, %1, %cst {dimension_numbers = #tpu.dot_dimension_numbers<[1], [0], [0], [1], [0, 0, 1, 1], [], []>} : vector<8x256xf32>, vector<256x32xf32>, vector<8x32xf32> -> vector<8x32xf32>
    %c0_3 = arith.constant 0 : index
    %c0_4 = arith.constant 0 : index
    %3 = vector.load %arg3[%c0_3, %c0_4] : memref<1x32xf32, #tpu.memory_space<vmem>>, vector<1x32xf32>
    %4 = vector.broadcast %3 : vector<1x32xf32> to vector<8x32xf32>
    %5 = arith.addf %2, %4 : vector<8x32xf32>
    %c0_5 = arith.constant 0 : index
    %c0_6 = arith.constant 0 : index
    %6 = vector.load %arg1[%c0_5, %c0_6] : memref<8x32xf32, #tpu.memory_space<vmem>>, vector<8x32xf32>
    %7 = arith.addf %5, %6 : vector<8x32xf32>
    %c0_7 = arith.constant 0 : index
    %c0_8 = arith.constant 0 : index
    %8 = vector.load %arg4[%c0_7, %c0_8] : memref<8x8xf32, #tpu.memory_space<vmem>>, vector<8x8xf32>
    %c0_9 = arith.constant 0 : index
    %c0_10 = arith.constant 0 : index
    %c0_11 = arith.constant 0 : index
    %9 = vector.load %arg5[%c0_9, %c0_10, %c0_11] : memref<2x1x32xf32, #tpu.memory_space<vmem>>, vector<1x1x32xf32>
    %10 = vector.shape_cast %9 : vector<1x1x32xf32> to vector<1x32xf32>
    %c0_12 = arith.constant 0 : index
    %c0_13 = arith.constant 0 : index
    %c0_14 = arith.constant 0 : index
    %11 = vector.load %arg6[%c0_12, %c0_13, %c0_14] : memref<2x1x32xf32, #tpu.memory_space<vmem>>, vector<1x1x32xf32>
    %12 = vector.shape_cast %11 : vector<1x1x32xf32> to vector<1x32xf32>
    %cst_15 = arith.constant dense<0.000000e+00> : vector<8xf32>
    %13 = vector.multi_reduction <add>, %7, %cst_15 [1] : vector<8x32xf32> to vector<8xf32>
    %14 = vector.shape_cast %13 : vector<8xf32> to vector<8x1xf32>
    %cst_16 = arith.constant 3.200000e+01 : f32
    %15 = vector.broadcast %cst_16 : f32 to vector<8x1xf32>
    %16 = arith.divf %14, %15 : vector<8x1xf32>
    %17 = vector.broadcast %16 : vector<8x1xf32> to vector<8x32xf32>
    %18 = arith.subf %7, %17 : vector<8x32xf32>
    %19 = arith.mulf %18, %18 : vector<8x32xf32>
    %cst_17 = arith.constant dense<0.000000e+00> : vector<8xf32>
    %20 = vector.multi_reduction <add>, %19, %cst_17 [1] : vector<8x32xf32> to vector<8xf32>
    %21 = vector.shape_cast %20 : vector<8xf32> to vector<8x1xf32>
    %cst_18 = arith.constant 3.200000e+01 : f32
    %22 = vector.broadcast %cst_18 : f32 to vector<8x1xf32>
    %23 = arith.divf %21, %22 : vector<8x1xf32>
    %24 = vector.broadcast %16 : vector<8x1xf32> to vector<8x32xf32>
    %25 = arith.subf %7, %24 : vector<8x32xf32>
    %cst_19 = arith.constant 9.99999997E-7 : f32
    %26 = vector.broadcast %cst_19 : f32 to vector<8x1xf32>
    %27 = arith.addf %23, %26 : vector<8x1xf32>
    %28 = math.rsqrt %27 : vector<8x1xf32>
    %29 = vector.broadcast %28 : vector<8x1xf32> to vector<8x32xf32>
    %30 = arith.mulf %25, %29 : vector<8x32xf32>
    %31 = vector.broadcast %10 : vector<1x32xf32> to vector<8x32xf32>
    %32 = arith.mulf %30, %31 : vector<8x32xf32>
    %33 = vector.broadcast %12 : vector<1x32xf32> to vector<8x32xf32>
    %34 = arith.addf %32, %33 : vector<8x32xf32>
    %c0_20 = arith.constant 0 : index
    %c0_21 = arith.constant 0 : index
    %c0_22 = arith.constant 0 : index
    %35 = vector.load %arg7[%c0_20, %c0_21, %c0_22] : memref<2x32x96xf32, #tpu.memory_space<vmem>>, vector<1x32x96xf32>
    %36 = vector.shape_cast %35 : vector<1x32x96xf32> to vector<32x96xf32>
    %cst_23 = arith.constant dense<0.000000e+00> : vector<8x96xf32>
    %37 = tpu.matmul %34, %36, %cst_23 {dimension_numbers = #tpu.dot_dimension_numbers<[1], [0], [0], [1], [0, 0, 1, 1], [], []>} : vector<8x32xf32>, vector<32x96xf32>, vector<8x96xf32> -> vector<8x96xf32>
    %c0_24 = arith.constant 0 : index
    %c0_25 = arith.constant 0 : index
    %c0_26 = arith.constant 0 : index
    %38 = vector.load %arg8[%c0_24, %c0_25, %c0_26] : memref<2x1x96xf32, #tpu.memory_space<vmem>>, vector<1x1x96xf32>
    %39 = vector.shape_cast %38 : vector<1x1x96xf32> to vector<1x96xf32>
    %40 = vector.broadcast %39 : vector<1x96xf32> to vector<8x96xf32>
    %41 = arith.addf %37, %40 : vector<8x96xf32>
    %42 = vector.extract_strided_slice %41 {offsets = [0, 0], sizes = [8, 16], strides = [1, 1]} : vector<8x96xf32> to vector<8x16xf32>
    %43 = vector.extract_strided_slice %41 {offsets = [0, 32], sizes = [8, 16], strides = [1, 1]} : vector<8x96xf32> to vector<8x16xf32>
    %44 = vector.extract_strided_slice %41 {offsets = [0, 64], sizes = [8, 16], strides = [1, 1]} : vector<8x96xf32> to vector<8x16xf32>
    %cst_27 = arith.constant dense<0.000000e+00> : vector<8x8xf32>
    %45 = tpu.matmul %42, %43, %cst_27 {dimension_numbers = #tpu.dot_dimension_numbers<[1], [1], [0], [0], [0, 0, 1, 0], [], []>} : vector<8x16xf32>, vector<8x16xf32>, vector<8x8xf32> -> vector<8x8xf32>
    %46 = arith.addf %45, %8 : vector<8x8xf32>
    %cst_28 = arith.constant dense<0xFF800000> : vector<8xf32>
    %47 = vector.multi_reduction <maximumf>, %46, %cst_28 [1] : vector<8x8xf32> to vector<8xf32>
    %48 = vector.shape_cast %47 : vector<8xf32> to vector<8x1xf32>
    %49 = vector.broadcast %48 : vector<8x1xf32> to vector<8x8xf32>
    %50 = arith.subf %46, %49 : vector<8x8xf32>
    %51 = math.exp %50 : vector<8x8xf32>
    %cst_29 = arith.constant dense<0.000000e+00> : vector<8xf32>
    %52 = vector.multi_reduction <add>, %51, %cst_29 [1] : vector<8x8xf32> to vector<8xf32>
    %53 = vector.shape_cast %52 : vector<8xf32> to vector<8x1xf32>
    %54 = vector.broadcast %53 : vector<8x1xf32> to vector<8x8xf32>
    %55 = arith.divf %51, %54 : vector<8x8xf32>
    %cst_30 = arith.constant dense<0.000000e+00> : vector<8x16xf32>
    %56 = tpu.matmul %55, %44, %cst_30 {dimension_numbers = #tpu.dot_dimension_numbers<[1], [0], [0], [1], [0, 0, 1, 1], [], []>} : vector<8x8xf32>, vector<8x16xf32>, vector<8x16xf32> -> vector<8x16xf32>
    %c0_31 = arith.constant 0 : index
    %c0_32 = arith.constant 0 : index
    %57 = vector.load %arg25[%c0_31, %c0_32] : memref<8x32xf32, #tpu.memory_space<vmem>>, vector<8x16xf32>
    tpu.vector_store %arg25[%c0_31, %c0_32], %56 {strides = array<i32>} : memref<8x32xf32, #tpu.memory_space<vmem>>, vector<8x16xf32>,
    %58 = vector.extract_strided_slice %41 {offsets = [0, 16], sizes = [8, 16], strides = [1, 1]} : vector<8x96xf32> to vector<8x16xf32>
    %59 = vector.extract_strided_slice %41 {offsets = [0, 48], sizes = [8, 16], strides = [1, 1]} : vector<8x96xf32> to vector<8x16xf32>
    %60 = vector.extract_strided_slice %41 {offsets = [0, 80], sizes = [8, 16], strides = [1, 1]} : vector<8x96xf32> to vector<8x16xf32>
    %cst_33 = arith.constant dense<0.000000e+00> : vector<8x8xf32>
    %61 = tpu.matmul %58, %59, %cst_33 {dimension_numbers = #tpu.dot_dimension_numbers<[1], [1], [0], [0], [0, 0, 1, 0], [], []>} : vector<8x16xf32>, vector<8x16xf32>, vector<8x8xf32> -> vector<8x8xf32>
    %62 = arith.addf %61, %8 : vector<8x8xf32>
    %cst_34 = arith.constant dense<0xFF800000> : vector<8xf32>
    %63 = vector.multi_reduction <maximumf>, %62, %cst_34 [1] : vector<8x8xf32> to vector<8xf32>
    %64 = vector.shape_cast %63 : vector<8xf32> to vector<8x1xf32>
    %65 = vector.broadcast %64 : vector<8x1xf32> to vector<8x8xf32>
    %66 = arith.subf %62, %65 : vector<8x8xf32>
    %67 = math.exp %66 : vector<8x8xf32>
    %cst_35 = arith.constant dense<0.000000e+00> : vector<8xf32>
    %68 = vector.multi_reduction <add>, %67, %cst_35 [1] : vector<8x8xf32> to vector<8xf32>
    %69 = vector.shape_cast %68 : vector<8xf32> to vector<8x1xf32>
    %70 = vector.broadcast %69 : vector<8x1xf32> to vector<8x8xf32>
    %71 = arith.divf %67, %70 : vector<8x8xf32>
    %cst_36 = arith.constant dense<0.000000e+00> : vector<8x16xf32>
    %72 = tpu.matmul %71, %60, %cst_36 {dimension_numbers = #tpu.dot_dimension_numbers<[1], [0], [0], [1], [0, 0, 1, 1], [], []>} : vector<8x8xf32>, vector<8x16xf32>, vector<8x16xf32> -> vector<8x16xf32>
    %c0_37 = arith.constant 0 : index
    %c16 = arith.constant 16 : index
    %73 = vector.load %arg25[%c0_37, %c16] : memref<8x32xf32, #tpu.memory_space<vmem>>, vector<8x16xf32>
    tpu.vector_store %arg25[%c0_37, %c16], %72 {strides = array<i32>} : memref<8x32xf32, #tpu.memory_space<vmem>>, vector<8x16xf32>,
    %c0_38 = arith.constant 0 : index
    %c0_39 = arith.constant 0 : index
    %74 = vector.load %arg25[%c0_38, %c0_39] : memref<8x32xf32, #tpu.memory_space<vmem>>, vector<8x32xf32>
    %c0_40 = arith.constant 0 : index
    %c0_41 = arith.constant 0 : index
    %c0_42 = arith.constant 0 : index
    %75 = vector.load %arg9[%c0_40, %c0_41, %c0_42] : memref<2x32x32xf32, #tpu.memory_space<vmem>>, vector<1x32x32xf32>
    %76 = vector.shape_cast %75 : vector<1x32x32xf32> to vector<32x32xf32>
    %cst_43 = arith.constant dense<0.000000e+00> : vector<8x32xf32>
    %77 = tpu.matmul %74, %76, %cst_43 {dimension_numbers = #tpu.dot_dimension_numbers<[1], [0], [0], [1], [0, 0, 1, 1], [], []>} : vector<8x32xf32>, vector<32x32xf32>, vector<8x32xf32> -> vector<8x32xf32>
    %c0_44 = arith.constant 0 : index
    %c0_45 = arith.constant 0 : index
    %c0_46 = arith.constant 0 : index
    %78 = vector.load %arg10[%c0_44, %c0_45, %c0_46] : memref<2x1x32xf32, #tpu.memory_space<vmem>>, vector<1x1x32xf32>
    %79 = vector.shape_cast %78 : vector<1x1x32xf32> to vector<1x32xf32>
    %80 = vector.broadcast %79 : vector<1x32xf32> to vector<8x32xf32>
    %81 = arith.addf %77, %80 : vector<8x32xf32>
    %82 = arith.addf %7, %81 : vector<8x32xf32>
    %c0_47 = arith.constant 0 : index
    %c0_48 = arith.constant 0 : index
    %c0_49 = arith.constant 0 : index
    %83 = vector.load %arg11[%c0_47, %c0_48, %c0_49] : memref<2x1x32xf32, #tpu.memory_space<vmem>>, vector<1x1x32xf32>
    %84 = vector.shape_cast %83 : vector<1x1x32xf32> to vector<1x32xf32>
    %c0_50 = arith.constant 0 : index
    %c0_51 = arith.constant 0 : index
    %c0_52 = arith.constant 0 : index
    %85 = vector.load %arg12[%c0_50, %c0_51, %c0_52] : memref<2x1x32xf32, #tpu.memory_space<vmem>>, vector<1x1x32xf32>
    %86 = vector.shape_cast %85 : vector<1x1x32xf32> to vector<1x32xf32>
    %cst_53 = arith.constant dense<0.000000e+00> : vector<8xf32>
    %87 = vector.multi_reduction <add>, %82, %cst_53 [1] : vector<8x32xf32> to vector<8xf32>
    %88 = vector.shape_cast %87 : vector<8xf32> to vector<8x1xf32>
    %cst_54 = arith.constant 3.200000e+01 : f32
    %89 = vector.broadcast %cst_54 : f32 to vector<8x1xf32>
    %90 = arith.divf %88, %89 : vector<8x1xf32>
    %91 = vector.broadcast %90 : vector<8x1xf32> to vector<8x32xf32>
    %92 = arith.subf %82, %91 : vector<8x32xf32>
    %93 = arith.mulf %92, %92 : vector<8x32xf32>
    %cst_55 = arith.constant dense<0.000000e+00> : vector<8xf32>
    %94 = vector.multi_reduction <add>, %93, %cst_55 [1] : vector<8x32xf32> to vector<8xf32>
    %95 = vector.shape_cast %94 : vector<8xf32> to vector<8x1xf32>
    %cst_56 = arith.constant 3.200000e+01 : f32
    %96 = vector.broadcast %cst_56 : f32 to vector<8x1xf32>
    %97 = arith.divf %95, %96 : vector<8x1xf32>
    %98 = vector.broadcast %90 : vector<8x1xf32> to vector<8x32xf32>
    %99 = arith.subf %82, %98 : vector<8x32xf32>
    %cst_57 = arith.constant 9.99999997E-7 : f32
    %100 = vector.broadcast %cst_57 : f32 to vector<8x1xf32>
    %101 = arith.addf %97, %100 : vector<8x1xf32>
    %102 = math.rsqrt %101 : vector<8x1xf32>
    %103 = vector.broadcast %102 : vector<8x1xf32> to vector<8x32xf32>
    %104 = arith.mulf %99, %103 : vector<8x32xf32>
    %105 = vector.broadcast %84 : vector<1x32xf32> to vector<8x32xf32>
    %106 = arith.mulf %104, %105 : vector<8x32xf32>
    %107 = vector.broadcast %86 : vector<1x32xf32> to vector<8x32xf32>
    %108 = arith.addf %106, %107 : vector<8x32xf32>
    %c0_58 = arith.constant 0 : index
    %c0_59 = arith.constant 0 : index
    %c0_60 = arith.constant 0 : index
    %109 = vector.load %arg13[%c0_58, %c0_59, %c0_60] : memref<2x32x128xf32, #tpu.memory_space<vmem>>, vector<1x32x128xf32>
    %110 = vector.shape_cast %109 : vector<1x32x128xf32> to vector<32x128xf32>
    %cst_61 = arith.constant dense<0.000000e+00> : vector<8x128xf32>
    %111 = tpu.matmul %108, %110, %cst_61 {dimension_numbers = #tpu.dot_dimension_numbers<[1], [0], [0], [1], [0, 0, 1, 1], [], []>} : vector<8x32xf32>, vector<32x128xf32>, vector<8x128xf32> -> vector<8x128xf32>
    %c0_62 = arith.constant 0 : index
    %c0_63 = arith.constant 0 : index
    %c0_64 = arith.constant 0 : index
    %112 = vector.load %arg14[%c0_62, %c0_63, %c0_64] : memref<2x1x128xf32, #tpu.memory_space<vmem>>, vector<1x1x128xf32>
    %113 = vector.shape_cast %112 : vector<1x1x128xf32> to vector<1x128xf32>
    %114 = vector.broadcast %113 : vector<1x128xf32> to vector<8x128xf32>
    %115 = arith.addf %111, %114 : vector<8x128xf32>
    %116 = arith.mulf %115, %115 : vector<8x128xf32>
    %117 = arith.mulf %115, %116 : vector<8x128xf32>
    %cst_65 = arith.constant 4.471500e-02 : f32
    %118 = vector.broadcast %cst_65 : f32 to vector<8x128xf32>
    %119 = arith.mulf %118, %117 : vector<8x128xf32>
    %120 = arith.addf %115, %119 : vector<8x128xf32>
    %cst_66 = arith.constant 0.797884583 : f32
    %121 = vector.broadcast %cst_66 : f32 to vector<8x128xf32>
    %122 = arith.mulf %121, %120 : vector<8x128xf32>
    %123 = math.tanh %122 : vector<8x128xf32>
    %cst_67 = arith.constant 1.000000e+00 : f32
    %124 = vector.broadcast %cst_67 : f32 to vector<8x128xf32>
    %125 = arith.addf %124, %123 : vector<8x128xf32>
    %cst_68 = arith.constant 5.000000e-01 : f32
    %126 = vector.broadcast %cst_68 : f32 to vector<8x128xf32>
    %127 = arith.mulf %126, %125 : vector<8x128xf32>
    %128 = arith.mulf %115, %127 : vector<8x128xf32>
    %c0_69 = arith.constant 0 : index
    %c0_70 = arith.constant 0 : index
    %c0_71 = arith.constant 0 : index
    %129 = vector.load %arg15[%c0_69, %c0_70, %c0_71] : memref<2x128x32xf32, #tpu.memory_space<vmem>>, vector<1x128x32xf32>
    %130 = vector.shape_cast %129 : vector<1x128x32xf32> to vector<128x32xf32>
    %cst_72 = arith.constant dense<0.000000e+00> : vector<8x32xf32>
    %131 = tpu.matmul %128, %130, %cst_72 {dimension_numbers = #tpu.dot_dimension_numbers<[1], [0], [0], [1], [0, 0, 1, 1], [], []>} : vector<8x128xf32>, vector<128x32xf32>, vector<8x32xf32> -> vector<8x32xf32>
    %c0_73 = arith.constant 0 : index
    %c0_74 = arith.constant 0 : index
    %c0_75 = arith.constant 0 : index
    %132 = vector.load %arg16[%c0_73, %c0_74, %c0_75] : memref<2x1x32xf32, #tpu.memory_space<vmem>>, vector<1x1x32xf32>
    %133 = vector.shape_cast %132 : vector<1x1x32xf32> to vector<1x32xf32>
    %134 = vector.broadcast %133 : vector<1x32xf32> to vector<8x32xf32>
    %135 = arith.addf %131, %134 : vector<8x32xf32>
    %136 = arith.addf %82, %135 : vector<8x32xf32>
    %c1 = arith.constant 1 : index
    %c0_76 = arith.constant 0 : index
    %c0_77 = arith.constant 0 : index
    %137 = vector.load %arg5[%c1, %c0_76, %c0_77] : memref<2x1x32xf32, #tpu.memory_space<vmem>>, vector<1x1x32xf32>
    %138 = vector.shape_cast %137 : vector<1x1x32xf32> to vector<1x32xf32>
    %c1_78 = arith.constant 1 : index
    %c0_79 = arith.constant 0 : index
    %c0_80 = arith.constant 0 : index
    %139 = vector.load %arg6[%c1_78, %c0_79, %c0_80] : memref<2x1x32xf32, #tpu.memory_space<vmem>>, vector<1x1x32xf32>
    %140 = vector.shape_cast %139 : vector<1x1x32xf32> to vector<1x32xf32>
    %cst_81 = arith.constant dense<0.000000e+00> : vector<8xf32>
    %141 = vector.multi_reduction <add>, %136, %cst_81 [1] : vector<8x32xf32> to vector<8xf32>
    %142 = vector.shape_cast %141 : vector<8xf32> to vector<8x1xf32>
    %cst_82 = arith.constant 3.200000e+01 : f32
    %143 = vector.broadcast %cst_82 : f32 to vector<8x1xf32>
    %144 = arith.divf %142, %143 : vector<8x1xf32>
    %145 = vector.broadcast %144 : vector<8x1xf32> to vector<8x32xf32>
    %146 = arith.subf %136, %145 : vector<8x32xf32>
    %147 = arith.mulf %146, %146 : vector<8x32xf32>
    %cst_83 = arith.constant dense<0.000000e+00> : vector<8xf32>
    %148 = vector.multi_reduction <add>, %147, %cst_83 [1] : vector<8x32xf32> to vector<8xf32>
    %149 = vector.shape_cast %148 : vector<8xf32> to vector<8x1xf32>
    %cst_84 = arith.constant 3.200000e+01 : f32
    %150 = vector.broadcast %cst_84 : f32 to vector<8x1xf32>
    %151 = arith.divf %149, %150 : vector<8x1xf32>
    %152 = vector.broadcast %144 : vector<8x1xf32> to vector<8x32xf32>
    %153 = arith.subf %136, %152 : vector<8x32xf32>
    %cst_85 = arith.constant 9.99999997E-7 : f32
    %154 = vector.broadcast %cst_85 : f32 to vector<8x1xf32>
    %155 = arith.addf %151, %154 : vector<8x1xf32>
    %156 = math.rsqrt %155 : vector<8x1xf32>
    %157 = vector.broadcast %156 : vector<8x1xf32> to vector<8x32xf32>
    %158 = arith.mulf %153, %157 : vector<8x32xf32>
    %159 = vector.broadcast %138 : vector<1x32xf32> to vector<8x32xf32>
    %160 = arith.mulf %158, %159 : vector<8x32xf32>
    %161 = vector.broadcast %140 : vector<1x32xf32> to vector<8x32xf32>
    %162 = arith.addf %160, %161 : vector<8x32xf32>
    %c1_86 = arith.constant 1 : index
    %c0_87 = arith.constant 0 : index
    %c0_88 = arith.constant 0 : index
    %163 = vector.load %arg7[%c1_86, %c0_87, %c0_88] : memref<2x32x96xf32, #tpu.memory_space<vmem>>, vector<1x32x96xf32>
    %164 = vector.shape_cast %163 : vector<1x32x96xf32> to vector<32x96xf32>
    %cst_89 = arith.constant dense<0.000000e+00> : vector<8x96xf32>
    %165 = tpu.matmul %162, %164, %cst_89 {dimension_numbers = #tpu.dot_dimension_numbers<[1], [0], [0], [1], [0, 0, 1, 1], [], []>} : vector<8x32xf32>, vector<32x96xf32>, vector<8x96xf32> -> vector<8x96xf32>
    %c1_90 = arith.constant 1 : index
    %c0_91 = arith.constant 0 : index
    %c0_92 = arith.constant 0 : index
    %166 = vector.load %arg8[%c1_90, %c0_91, %c0_92] : memref<2x1x96xf32, #tpu.memory_space<vmem>>, vector<1x1x96xf32>
    %167 = vector.shape_cast %166 : vector<1x1x96xf32> to vector<1x96xf32>
    %168 = vector.broadcast %167 : vector<1x96xf32> to vector<8x96xf32>
    %169 = arith.addf %165, %168 : vector<8x96xf32>
    %170 = vector.extract_strided_slice %169 {offsets = [0, 0], sizes = [8, 16], strides = [1, 1]} : vector<8x96xf32> to vector<8x16xf32>
    %171 = vector.extract_strided_slice %169 {offsets = [0, 32], sizes = [8, 16], strides = [1, 1]} : vector<8x96xf32> to vector<8x16xf32>
    %172 = vector.extract_strided_slice %169 {offsets = [0, 64], sizes = [8, 16], strides = [1, 1]} : vector<8x96xf32> to vector<8x16xf32>
    %cst_93 = arith.constant dense<0.000000e+00> : vector<8x8xf32>
    %173 = tpu.matmul %170, %171, %cst_93 {dimension_numbers = #tpu.dot_dimension_numbers<[1], [1], [0], [0], [0, 0, 1, 0], [], []>} : vector<8x16xf32>, vector<8x16xf32>, vector<8x8xf32> -> vector<8x8xf32>
    %174 = arith.addf %173, %8 : vector<8x8xf32>
    %cst_94 = arith.constant dense<0xFF800000> : vector<8xf32>
    %175 = vector.multi_reduction <maximumf>, %174, %cst_94 [1] : vector<8x8xf32> to vector<8xf32>
    %176 = vector.shape_cast %175 : vector<8xf32> to vector<8x1xf32>
    %177 = vector.broadcast %176 : vector<8x1xf32> to vector<8x8xf32>
    %178 = arith.subf %174, %177 : vector<8x8xf32>
    %179 = math.exp %178 : vector<8x8xf32>
    %cst_95 = arith.constant dense<0.000000e+00> : vector<8xf32>
    %180 = vector.multi_reduction <add>, %179, %cst_95 [1] : vector<8x8xf32> to vector<8xf32>
    %181 = vector.shape_cast %180 : vector<8xf32> to vector<8x1xf32>
    %182 = vector.broadcast %181 : vector<8x1xf32> to vector<8x8xf32>
    %183 = arith.divf %179, %182 : vector<8x8xf32>
    %cst_96 = arith.constant dense<0.000000e+00> : vector<8x16xf32>
    %184 = tpu.matmul %183, %172, %cst_96 {dimension_numbers = #tpu.dot_dimension_numbers<[1], [0], [0], [1], [0, 0, 1, 1], [], []>} : vector<8x8xf32>, vector<8x16xf32>, vector<8x16xf32> -> vector<8x16xf32>
    %c0_97 = arith.constant 0 : index
    %c0_98 = arith.constant 0 : index
    %185 = vector.load %arg25[%c0_97, %c0_98] : memref<8x32xf32, #tpu.memory_space<vmem>>, vector<8x16xf32>
    tpu.vector_store %arg25[%c0_97, %c0_98], %184 {strides = array<i32>} : memref<8x32xf32, #tpu.memory_space<vmem>>, vector<8x16xf32>,
    %186 = vector.extract_strided_slice %169 {offsets = [0, 16], sizes = [8, 16], strides = [1, 1]} : vector<8x96xf32> to vector<8x16xf32>
    %187 = vector.extract_strided_slice %169 {offsets = [0, 48], sizes = [8, 16], strides = [1, 1]} : vector<8x96xf32> to vector<8x16xf32>
    %188 = vector.extract_strided_slice %169 {offsets = [0, 80], sizes = [8, 16], strides = [1, 1]} : vector<8x96xf32> to vector<8x16xf32>
    %cst_99 = arith.constant dense<0.000000e+00> : vector<8x8xf32>
    %189 = tpu.matmul %186, %187, %cst_99 {dimension_numbers = #tpu.dot_dimension_numbers<[1], [1], [0], [0], [0, 0, 1, 0], [], []>} : vector<8x16xf32>, vector<8x16xf32>, vector<8x8xf32> -> vector<8x8xf32>
    %190 = arith.addf %189, %8 : vector<8x8xf32>
    %cst_100 = arith.constant dense<0xFF800000> : vector<8xf32>
    %191 = vector.multi_reduction <maximumf>, %190, %cst_100 [1] : vector<8x8xf32> to vector<8xf32>
    %192 = vector.shape_cast %191 : vector<8xf32> to vector<8x1xf32>
    %193 = vector.broadcast %192 : vector<8x1xf32> to vector<8x8xf32>
    %194 = arith.subf %190, %193 : vector<8x8xf32>
    %195 = math.exp %194 : vector<8x8xf32>
    %cst_101 = arith.constant dense<0.000000e+00> : vector<8xf32>
    %196 = vector.multi_reduction <add>, %195, %cst_101 [1] : vector<8x8xf32> to vector<8xf32>
    %197 = vector.shape_cast %196 : vector<8xf32> to vector<8x1xf32>
    %198 = vector.broadcast %197 : vector<8x1xf32> to vector<8x8xf32>
    %199 = arith.divf %195, %198 : vector<8x8xf32>
    %cst_102 = arith.constant dense<0.000000e+00> : vector<8x16xf32>
    %200 = tpu.matmul %199, %188, %cst_102 {dimension_numbers = #tpu.dot_dimension_numbers<[1], [0], [0], [1], [0, 0, 1, 1], [], []>} : vector<8x8xf32>, vector<8x16xf32>, vector<8x16xf32> -> vector<8x16xf32>
    %c0_103 = arith.constant 0 : index
    %c16_104 = arith.constant 16 : index
    %201 = vector.load %arg25[%c0_103, %c16_104] : memref<8x32xf32, #tpu.memory_space<vmem>>, vector<8x16xf32>
    tpu.vector_store %arg25[%c0_103, %c16_104], %200 {strides = array<i32>} : memref<8x32xf32, #tpu.memory_space<vmem>>, vector<8x16xf32>,
    %c0_105 = arith.constant 0 : index
    %c0_106 = arith.constant 0 : index
    %202 = vector.load %arg25[%c0_105, %c0_106] : memref<8x32xf32, #tpu.memory_space<vmem>>, vector<8x32xf32>
    %c1_107 = arith.constant 1 : index
    %c0_108 = arith.constant 0 : index
    %c0_109 = arith.constant 0 : index
    %203 = vector.load %arg9[%c1_107, %c0_108, %c0_109] : memref<2x32x32xf32, #tpu.memory_space<vmem>>, vector<1x32x32xf32>
    %204 = vector.shape_cast %203 : vector<1x32x32xf32> to vector<32x32xf32>
    %cst_110 = arith.constant dense<0.000000e+00> : vector<8x32xf32>
    %205 = tpu.matmul %202, %204, %cst_110 {dimension_numbers = #tpu.dot_dimension_numbers<[1], [0], [0], [1], [0, 0, 1, 1], [], []>} : vector<8x32xf32>, vector<32x32xf32>, vector<8x32xf32> -> vector<8x32xf32>
    %c1_111 = arith.constant 1 : index
    %c0_112 = arith.constant 0 : index
    %c0_113 = arith.constant 0 : index
    %206 = vector.load %arg10[%c1_111, %c0_112, %c0_113] : memref<2x1x32xf32, #tpu.memory_space<vmem>>, vector<1x1x32xf32>
    %207 = vector.shape_cast %206 : vector<1x1x32xf32> to vector<1x32xf32>
    %208 = vector.broadcast %207 : vector<1x32xf32> to vector<8x32xf32>
    %209 = arith.addf %205, %208 : vector<8x32xf32>
    %210 = arith.addf %136, %209 : vector<8x32xf32>
    %c1_114 = arith.constant 1 : index
    %c0_115 = arith.constant 0 : index
    %c0_116 = arith.constant 0 : index
    %211 = vector.load %arg11[%c1_114, %c0_115, %c0_116] : memref<2x1x32xf32, #tpu.memory_space<vmem>>, vector<1x1x32xf32>
    %212 = vector.shape_cast %211 : vector<1x1x32xf32> to vector<1x32xf32>
    %c1_117 = arith.constant 1 : index
    %c0_118 = arith.constant 0 : index
    %c0_119 = arith.constant 0 : index
    %213 = vector.load %arg12[%c1_117, %c0_118, %c0_119] : memref<2x1x32xf32, #tpu.memory_space<vmem>>, vector<1x1x32xf32>
    %214 = vector.shape_cast %213 : vector<1x1x32xf32> to vector<1x32xf32>
    %cst_120 = arith.constant dense<0.000000e+00> : vector<8xf32>
    %215 = vector.multi_reduction <add>, %210, %cst_120 [1] : vector<8x32xf32> to vector<8xf32>
    %216 = vector.shape_cast %215 : vector<8xf32> to vector<8x1xf32>
    %cst_121 = arith.constant 3.200000e+01 : f32
    %217 = vector.broadcast %cst_121 : f32 to vector<8x1xf32>
    %218 = arith.divf %216, %217 : vector<8x1xf32>
    %219 = vector.broadcast %218 : vector<8x1xf32> to vector<8x32xf32>
    %220 = arith.subf %210, %219 : vector<8x32xf32>
    %221 = arith.mulf %220, %220 : vector<8x32xf32>
    %cst_122 = arith.constant dense<0.000000e+00> : vector<8xf32>
    %222 = vector.multi_reduction <add>, %221, %cst_122 [1] : vector<8x32xf32> to vector<8xf32>
    %223 = vector.shape_cast %222 : vector<8xf32> to vector<8x1xf32>
    %cst_123 = arith.constant 3.200000e+01 : f32
    %224 = vector.broadcast %cst_123 : f32 to vector<8x1xf32>
    %225 = arith.divf %223, %224 : vector<8x1xf32>
    %226 = vector.broadcast %218 : vector<8x1xf32> to vector<8x32xf32>
    %227 = arith.subf %210, %226 : vector<8x32xf32>
    %cst_124 = arith.constant 9.99999997E-7 : f32
    %228 = vector.broadcast %cst_124 : f32 to vector<8x1xf32>
    %229 = arith.addf %225, %228 : vector<8x1xf32>
    %230 = math.rsqrt %229 : vector<8x1xf32>
    %231 = vector.broadcast %230 : vector<8x1xf32> to vector<8x32xf32>
    %232 = arith.mulf %227, %231 : vector<8x32xf32>
    %233 = vector.broadcast %212 : vector<1x32xf32> to vector<8x32xf32>
    %234 = arith.mulf %232, %233 : vector<8x32xf32>
    %235 = vector.broadcast %214 : vector<1x32xf32> to vector<8x32xf32>
    %236 = arith.addf %234, %235 : vector<8x32xf32>
    %c1_125 = arith.constant 1 : index
    %c0_126 = arith.constant 0 : index
    %c0_127 = arith.constant 0 : index
    %237 = vector.load %arg13[%c1_125, %c0_126, %c0_127] : memref<2x32x128xf32, #tpu.memory_space<vmem>>, vector<1x32x128xf32>
    %238 = vector.shape_cast %237 : vector<1x32x128xf32> to vector<32x128xf32>
    %cst_128 = arith.constant dense<0.000000e+00> : vector<8x128xf32>
    %239 = tpu.matmul %236, %238, %cst_128 {dimension_numbers = #tpu.dot_dimension_numbers<[1], [0], [0], [1], [0, 0, 1, 1], [], []>} : vector<8x32xf32>, vector<32x128xf32>, vector<8x128xf32> -> vector<8x128xf32>
    %c1_129 = arith.constant 1 : index
    %c0_130 = arith.constant 0 : index
    %c0_131 = arith.constant 0 : index
    %240 = vector.load %arg14[%c1_129, %c0_130, %c0_131] : memref<2x1x128xf32, #tpu.memory_space<vmem>>, vector<1x1x128xf32>
    %241 = vector.shape_cast %240 : vector<1x1x128xf32> to vector<1x128xf32>
    %242 = vector.broadcast %241 : vector<1x128xf32> to vector<8x128xf32>
    %243 = arith.addf %239, %242 : vector<8x128xf32>
    %244 = arith.mulf %243, %243 : vector<8x128xf32>
    %245 = arith.mulf %243, %244 : vector<8x128xf32>
    %cst_132 = arith.constant 4.471500e-02 : f32
    %246 = vector.broadcast %cst_132 : f32 to vector<8x128xf32>
    %247 = arith.mulf %246, %245 : vector<8x128xf32>
    %248 = arith.addf %243, %247 : vector<8x128xf32>
    %cst_133 = arith.constant 0.797884583 : f32
    %249 = vector.broadcast %cst_133 : f32 to vector<8x128xf32>
    %250 = arith.mulf %249, %248 : vector<8x128xf32>
    %251 = math.tanh %250 : vector<8x128xf32>
    %cst_134 = arith.constant 1.000000e+00 : f32
    %252 = vector.broadcast %cst_134 : f32 to vector<8x128xf32>
    %253 = arith.addf %252, %251 : vector<8x128xf32>
    %cst_135 = arith.constant 5.000000e-01 : f32
    %254 = vector.broadcast %cst_135 : f32 to vector<8x128xf32>
    %255 = arith.mulf %254, %253 : vector<8x128xf32>
    %256 = arith.mulf %243, %255 : vector<8x128xf32>
    %c1_136 = arith.constant 1 : index
    %c0_137 = arith.constant 0 : index
    %c0_138 = arith.constant 0 : index
    %257 = vector.load %arg15[%c1_136, %c0_137, %c0_138] : memref<2x128x32xf32, #tpu.memory_space<vmem>>, vector<1x128x32xf32>
    %258 = vector.shape_cast %257 : vector<1x128x32xf32> to vector<128x32xf32>
    %cst_139 = arith.constant dense<0.000000e+00> : vector<8x32xf32>
    %259 = tpu.matmul %256, %258, %cst_139 {dimension_numbers = #tpu.dot_dimension_numbers<[1], [0], [0], [1], [0, 0, 1, 1], [], []>} : vector<8x128xf32>, vector<128x32xf32>, vector<8x32xf32> -> vector<8x32xf32>
    %c1_140 = arith.constant 1 : index
    %c0_141 = arith.constant 0 : index
    %c0_142 = arith.constant 0 : index
    %260 = vector.load %arg16[%c1_140, %c0_141, %c0_142] : memref<2x1x32xf32, #tpu.memory_space<vmem>>, vector<1x1x32xf32>
    %261 = vector.shape_cast %260 : vector<1x1x32xf32> to vector<1x32xf32>
    %262 = vector.broadcast %261 : vector<1x32xf32> to vector<8x32xf32>
    %263 = arith.addf %259, %262 : vector<8x32xf32>
    %264 = arith.addf %210, %263 : vector<8x32xf32>
    %c0_143 = arith.constant 0 : index
    %c0_144 = arith.constant 0 : index
    %265 = vector.load %arg17[%c0_143, %c0_144] : memref<32x16xf32, #tpu.memory_space<vmem>>, vector<32x16xf32>
    %cst_145 = arith.constant dense<0.000000e+00> : vector<8x16xf32>
    %266 = tpu.matmul %264, %265, %cst_145 {dimension_numbers = #tpu.dot_dimension_numbers<[1], [0], [0], [1], [0, 0, 1, 1], [], []>} : vector<8x32xf32>, vector<32x16xf32>, vector<8x16xf32> -> vector<8x16xf32>
    %c0_146 = arith.constant 0 : index
    %c0_147 = arith.constant 0 : index
    %267 = vector.load %arg18[%c0_146, %c0_147] : memref<1x16xf32, #tpu.memory_space<vmem>>, vector<1x16xf32>
    %c0_148 = arith.constant 0 : index
    %c0_149 = arith.constant 0 : index
    %268 = vector.load %arg19[%c0_148, %c0_149] : memref<1x16xf32, #tpu.memory_space<vmem>>, vector<1x16xf32>
    %cst_150 = arith.constant dense<0.000000e+00> : vector<8xf32>
    %269 = vector.multi_reduction <add>, %266, %cst_150 [1] : vector<8x16xf32> to vector<8xf32>
    %270 = vector.shape_cast %269 : vector<8xf32> to vector<8x1xf32>
    %cst_151 = arith.constant 1.600000e+01 : f32
    %271 = vector.broadcast %cst_151 : f32 to vector<8x1xf32>
    %272 = arith.divf %270, %271 : vector<8x1xf32>
    %273 = vector.broadcast %272 : vector<8x1xf32> to vector<8x16xf32>
    %274 = arith.subf %266, %273 : vector<8x16xf32>
    %275 = arith.mulf %274, %274 : vector<8x16xf32>
    %cst_152 = arith.constant dense<0.000000e+00> : vector<8xf32>
    %276 = vector.multi_reduction <add>, %275, %cst_152 [1] : vector<8x16xf32> to vector<8xf32>
    %277 = vector.shape_cast %276 : vector<8xf32> to vector<8x1xf32>
    %cst_153 = arith.constant 1.600000e+01 : f32
    %278 = vector.broadcast %cst_153 : f32 to vector<8x1xf32>
    %279 = arith.divf %277, %278 : vector<8x1xf32>
    %280 = vector.broadcast %272 : vector<8x1xf32> to vector<8x16xf32>
    %281 = arith.subf %266, %280 : vector<8x16xf32>
    %cst_154 = arith.constant 9.99999997E-7 : f32
    %282 = vector.broadcast %cst_154 : f32 to vector<8x1xf32>
    %283 = arith.addf %279, %282 : vector<8x1xf32>
    %284 = math.rsqrt %283 : vector<8x1xf32>
    %285 = vector.broadcast %284 : vector<8x1xf32> to vector<8x16xf32>
    %286 = arith.mulf %281, %285 : vector<8x16xf32>
    %287 = vector.broadcast %267 : vector<1x16xf32> to vector<8x16xf32>
    %288 = arith.mulf %286, %287 : vector<8x16xf32>
    %289 = vector.broadcast %268 : vector<1x16xf32> to vector<8x16xf32>
    %290 = arith.addf %288, %289 : vector<8x16xf32>
    %cst_155 = arith.constant 0.000000e+00 : f32
    %291 = vector.broadcast %cst_155 : f32 to vector<8x16xf32>
    %c3_i32 = arith.constant 3 : i32
    %292 = tpu.dynamic_rotate %290 by %c3_i32 dim 0 : vector<8x16xf32>, i32 -> vector<8x16xf32>
    %c0_156 = arith.constant 0 : index
    %c0_157 = arith.constant 0 : index
    %c0_158 = arith.constant 0 : index
    %293 = vector.load %arg21[%c0_156, %c0_157, %c0_158] : memref<9x8x1xf32, #tpu.memory_space<vmem>>, vector<1x8x1xf32>
    %294 = vector.shape_cast %293 : vector<1x8x1xf32> to vector<8x1xf32>
    %295 = vector.broadcast %294 : vector<8x1xf32> to vector<8x16xf32>
    %296 = arith.mulf %292, %295 : vector<8x16xf32>
    %c0_159 = arith.constant 0 : index
    %c0_160 = arith.constant 0 : index
    %c0_161 = arith.constant 0 : index
    %297 = vector.load %arg20[%c0_159, %c0_160, %c0_161] : memref<9x16x16xf32, #tpu.memory_space<vmem>>, vector<1x16x16xf32>
    %298 = vector.shape_cast %297 : vector<1x16x16xf32> to vector<16x16xf32>
    %cst_162 = arith.constant dense<0.000000e+00> : vector<8x16xf32>
    %299 = tpu.matmul %296, %298, %cst_162 {dimension_numbers = #tpu.dot_dimension_numbers<[1], [0], [0], [1], [0, 0, 1, 1], [], []>} : vector<8x16xf32>, vector<16x16xf32>, vector<8x16xf32> -> vector<8x16xf32>
    %300 = arith.addf %291, %299 : vector<8x16xf32>
    %c2_i32 = arith.constant 2 : i32
    %301 = tpu.dynamic_rotate %290 by %c2_i32 dim 0 : vector<8x16xf32>, i32 -> vector<8x16xf32>
    %c1_163 = arith.constant 1 : index
    %c0_164 = arith.constant 0 : index
    %c0_165 = arith.constant 0 : index
    %302 = vector.load %arg21[%c1_163, %c0_164, %c0_165] : memref<9x8x1xf32, #tpu.memory_space<vmem>>, vector<1x8x1xf32>
    %303 = vector.shape_cast %302 : vector<1x8x1xf32> to vector<8x1xf32>
    %304 = vector.broadcast %303 : vector<8x1xf32> to vector<8x16xf32>
    %305 = arith.mulf %301, %304 : vector<8x16xf32>
    %c1_166 = arith.constant 1 : index
    %c0_167 = arith.constant 0 : index
    %c0_168 = arith.constant 0 : index
    %306 = vector.load %arg20[%c1_166, %c0_167, %c0_168] : memref<9x16x16xf32, #tpu.memory_space<vmem>>, vector<1x16x16xf32>
    %307 = vector.shape_cast %306 : vector<1x16x16xf32> to vector<16x16xf32>
    %cst_169 = arith.constant dense<0.000000e+00> : vector<8x16xf32>
    %308 = tpu.matmul %305, %307, %cst_169 {dimension_numbers = #tpu.dot_dimension_numbers<[1], [0], [0], [1], [0, 0, 1, 1], [], []>} : vector<8x16xf32>, vector<16x16xf32>, vector<8x16xf32> -> vector<8x16xf32>
    %309 = arith.addf %300, %308 : vector<8x16xf32>
    %c1_i32 = arith.constant 1 : i32
    %310 = tpu.dynamic_rotate %290 by %c1_i32 dim 0 : vector<8x16xf32>, i32 -> vector<8x16xf32>
    %c2 = arith.constant 2 : index
    %c0_170 = arith.constant 0 : index
    %c0_171 = arith.constant 0 : index
    %311 = vector.load %arg21[%c2, %c0_170, %c0_171] : memref<9x8x1xf32, #tpu.memory_space<vmem>>, vector<1x8x1xf32>
    %312 = vector.shape_cast %311 : vector<1x8x1xf32> to vector<8x1xf32>
    %313 = vector.broadcast %312 : vector<8x1xf32> to vector<8x16xf32>
    %314 = arith.mulf %310, %313 : vector<8x16xf32>
    %c2_172 = arith.constant 2 : index
    %c0_173 = arith.constant 0 : index
    %c0_174 = arith.constant 0 : index
    %315 = vector.load %arg20[%c2_172, %c0_173, %c0_174] : memref<9x16x16xf32, #tpu.memory_space<vmem>>, vector<1x16x16xf32>
    %316 = vector.shape_cast %315 : vector<1x16x16xf32> to vector<16x16xf32>
    %cst_175 = arith.constant dense<0.000000e+00> : vector<8x16xf32>
    %317 = tpu.matmul %314, %316, %cst_175 {dimension_numbers = #tpu.dot_dimension_numbers<[1], [0], [0], [1], [0, 0, 1, 1], [], []>} : vector<8x16xf32>, vector<16x16xf32>, vector<8x16xf32> -> vector<8x16xf32>
    %318 = arith.addf %309, %317 : vector<8x16xf32>
    %c1_i32_176 = arith.constant 1 : i32
    %319 = tpu.dynamic_rotate %290 by %c1_i32_176 dim 0 : vector<8x16xf32>, i32 -> vector<8x16xf32>
    %c3 = arith.constant 3 : index
    %c0_177 = arith.constant 0 : index
    %c0_178 = arith.constant 0 : index
    %320 = vector.load %arg21[%c3, %c0_177, %c0_178] : memref<9x8x1xf32, #tpu.memory_space<vmem>>, vector<1x8x1xf32>
    %321 = vector.shape_cast %320 : vector<1x8x1xf32> to vector<8x1xf32>
    %322 = vector.broadcast %321 : vector<8x1xf32> to vector<8x16xf32>
    %323 = arith.mulf %319, %322 : vector<8x16xf32>
    %c3_179 = arith.constant 3 : index
    %c0_180 = arith.constant 0 : index
    %c0_181 = arith.constant 0 : index
    %324 = vector.load %arg20[%c3_179, %c0_180, %c0_181] : memref<9x16x16xf32, #tpu.memory_space<vmem>>, vector<1x16x16xf32>
    %325 = vector.shape_cast %324 : vector<1x16x16xf32> to vector<16x16xf32>
    %cst_182 = arith.constant dense<0.000000e+00> : vector<8x16xf32>
    %326 = tpu.matmul %323, %325, %cst_182 {dimension_numbers = #tpu.dot_dimension_numbers<[1], [0], [0], [1], [0, 0, 1, 1], [], []>} : vector<8x16xf32>, vector<16x16xf32>, vector<8x16xf32> -> vector<8x16xf32>
    %327 = arith.addf %318, %326 : vector<8x16xf32>
    %c4 = arith.constant 4 : index
    %c0_183 = arith.constant 0 : index
    %c0_184 = arith.constant 0 : index
    %328 = vector.load %arg21[%c4, %c0_183, %c0_184] : memref<9x8x1xf32, #tpu.memory_space<vmem>>, vector<1x8x1xf32>
    %329 = vector.shape_cast %328 : vector<1x8x1xf32> to vector<8x1xf32>
    %330 = vector.broadcast %329 : vector<8x1xf32> to vector<8x16xf32>
    %331 = arith.mulf %290, %330 : vector<8x16xf32>
    %c4_185 = arith.constant 4 : index
    %c0_186 = arith.constant 0 : index
    %c0_187 = arith.constant 0 : index
    %332 = vector.load %arg20[%c4_185, %c0_186, %c0_187] : memref<9x16x16xf32, #tpu.memory_space<vmem>>, vector<1x16x16xf32>
    %333 = vector.shape_cast %332 : vector<1x16x16xf32> to vector<16x16xf32>
    %cst_188 = arith.constant dense<0.000000e+00> : vector<8x16xf32>
    %334 = tpu.matmul %331, %333, %cst_188 {dimension_numbers = #tpu.dot_dimension_numbers<[1], [0], [0], [1], [0, 0, 1, 1], [], []>} : vector<8x16xf32>, vector<16x16xf32>, vector<8x16xf32> -> vector<8x16xf32>
    %335 = arith.addf %327, %334 : vector<8x16xf32>
    %c7_i32 = arith.constant 7 : i32
    %336 = tpu.dynamic_rotate %290 by %c7_i32 dim 0 : vector<8x16xf32>, i32 -> vector<8x16xf32>
    %c5 = arith.constant 5 : index
    %c0_189 = arith.constant 0 : index
    %c0_190 = arith.constant 0 : index
    %337 = vector.load %arg21[%c5, %c0_189, %c0_190] : memref<9x8x1xf32, #tpu.memory_space<vmem>>, vector<1x8x1xf32>
    %338 = vector.shape_cast %337 : vector<1x8x1xf32> to vector<8x1xf32>
    %339 = vector.broadcast %338 : vector<8x1xf32> to vector<8x16xf32>
    %340 = arith.mulf %336, %339 : vector<8x16xf32>
    %c5_191 = arith.constant 5 : index
    %c0_192 = arith.constant 0 : index
    %c0_193 = arith.constant 0 : index
    %341 = vector.load %arg20[%c5_191, %c0_192, %c0_193] : memref<9x16x16xf32, #tpu.memory_space<vmem>>, vector<1x16x16xf32>
    %342 = vector.shape_cast %341 : vector<1x16x16xf32> to vector<16x16xf32>
    %cst_194 = arith.constant dense<0.000000e+00> : vector<8x16xf32>
    %343 = tpu.matmul %340, %342, %cst_194 {dimension_numbers = #tpu.dot_dimension_numbers<[1], [0], [0], [1], [0, 0, 1, 1], [], []>} : vector<8x16xf32>, vector<16x16xf32>, vector<8x16xf32> -> vector<8x16xf32>
    %344 = arith.addf %335, %343 : vector<8x16xf32>
    %c7_i32_195 = arith.constant 7 : i32
    %345 = tpu.dynamic_rotate %290 by %c7_i32_195 dim 0 : vector<8x16xf32>, i32 -> vector<8x16xf32>
    %c6 = arith.constant 6 : index
    %c0_196 = arith.constant 0 : index
    %c0_197 = arith.constant 0 : index
    %346 = vector.load %arg21[%c6, %c0_196, %c0_197] : memref<9x8x1xf32, #tpu.memory_space<vmem>>, vector<1x8x1xf32>
    %347 = vector.shape_cast %346 : vector<1x8x1xf32> to vector<8x1xf32>
    %348 = vector.broadcast %347 : vector<8x1xf32> to vector<8x16xf32>
    %349 = arith.mulf %345, %348 : vector<8x16xf32>
    %c6_198 = arith.constant 6 : index
    %c0_199 = arith.constant 0 : index
    %c0_200 = arith.constant 0 : index
    %350 = vector.load %arg20[%c6_198, %c0_199, %c0_200] : memref<9x16x16xf32, #tpu.memory_space<vmem>>, vector<1x16x16xf32>
    %351 = vector.shape_cast %350 : vector<1x16x16xf32> to vector<16x16xf32>
    %cst_201 = arith.constant dense<0.000000e+00> : vector<8x16xf32>
    %352 = tpu.matmul %349, %351, %cst_201 {dimension_numbers = #tpu.dot_dimension_numbers<[1], [0], [0], [1], [0, 0, 1, 1], [], []>} : vector<8x16xf32>, vector<16x16xf32>, vector<8x16xf32> -> vector<8x16xf32>
    %353 = arith.addf %344, %352 : vector<8x16xf32>
    %c6_i32 = arith.constant 6 : i32
    %354 = tpu.dynamic_rotate %290 by %c6_i32 dim 0 : vector<8x16xf32>, i32 -> vector<8x16xf32>
    %c7 = arith.constant 7 : index
    %c0_202 = arith.constant 0 : index
    %c0_203 = arith.constant 0 : index
    %355 = vector.load %arg21[%c7, %c0_202, %c0_203] : memref<9x8x1xf32, #tpu.memory_space<vmem>>, vector<1x8x1xf32>
    %356 = vector.shape_cast %355 : vector<1x8x1xf32> to vector<8x1xf32>
    %357 = vector.broadcast %356 : vector<8x1xf32> to vector<8x16xf32>
    %358 = arith.mulf %354, %357 : vector<8x16xf32>
    %c7_204 = arith.constant 7 : index
    %c0_205 = arith.constant 0 : index
    %c0_206 = arith.constant 0 : index
    %359 = vector.load %arg20[%c7_204, %c0_205, %c0_206] : memref<9x16x16xf32, #tpu.memory_space<vmem>>, vector<1x16x16xf32>
    %360 = vector.shape_cast %359 : vector<1x16x16xf32> to vector<16x16xf32>
    %cst_207 = arith.constant dense<0.000000e+00> : vector<8x16xf32>
    %361 = tpu.matmul %358, %360, %cst_207 {dimension_numbers = #tpu.dot_dimension_numbers<[1], [0], [0], [1], [0, 0, 1, 1], [], []>} : vector<8x16xf32>, vector<16x16xf32>, vector<8x16xf32> -> vector<8x16xf32>
    %362 = arith.addf %353, %361 : vector<8x16xf32>
    %c5_i32 = arith.constant 5 : i32
    %363 = tpu.dynamic_rotate %290 by %c5_i32 dim 0 : vector<8x16xf32>, i32 -> vector<8x16xf32>
    %c8 = arith.constant 8 : index
    %c0_208 = arith.constant 0 : index
    %c0_209 = arith.constant 0 : index
    %364 = vector.load %arg21[%c8, %c0_208, %c0_209] : memref<9x8x1xf32, #tpu.memory_space<vmem>>, vector<1x8x1xf32>
    %365 = vector.shape_cast %364 : vector<1x8x1xf32> to vector<8x1xf32>
    %366 = vector.broadcast %365 : vector<8x1xf32> to vector<8x16xf32>
    %367 = arith.mulf %363, %366 : vector<8x16xf32>
    %c8_210 = arith.constant 8 : index
    %c0_211 = arith.constant 0 : index
    %c0_212 = arith.constant 0 : index
    %368 = vector.load %arg20[%c8_210, %c0_211, %c0_212] : memref<9x16x16xf32, #tpu.memory_space<vmem>>, vector<1x16x16xf32>
    %369 = vector.shape_cast %368 : vector<1x16x16xf32> to vector<16x16xf32>
    %cst_213 = arith.constant dense<0.000000e+00> : vector<8x16xf32>
    %370 = tpu.matmul %367, %369, %cst_213 {dimension_numbers = #tpu.dot_dimension_numbers<[1], [0], [0], [1], [0, 0, 1, 1], [], []>} : vector<8x16xf32>, vector<16x16xf32>, vector<8x16xf32> -> vector<8x16xf32>
    %371 = arith.addf %362, %370 : vector<8x16xf32>
    %c0_214 = arith.constant 0 : index
    %c0_215 = arith.constant 0 : index
    %372 = vector.load %arg22[%c0_214, %c0_215] : memref<1x16xf32, #tpu.memory_space<vmem>>, vector<1x16xf32>
    %c0_216 = arith.constant 0 : index
    %c0_217 = arith.constant 0 : index
    %373 = vector.load %arg23[%c0_216, %c0_217] : memref<1x16xf32, #tpu.memory_space<vmem>>, vector<1x16xf32>
    %cst_218 = arith.constant dense<0.000000e+00> : vector<8xf32>
    %374 = vector.multi_reduction <add>, %371, %cst_218 [1] : vector<8x16xf32> to vector<8xf32>
    %375 = vector.shape_cast %374 : vector<8xf32> to vector<8x1xf32>
    %cst_219 = arith.constant 1.600000e+01 : f32
    %376 = vector.broadcast %cst_219 : f32 to vector<8x1xf32>
    %377 = arith.divf %375, %376 : vector<8x1xf32>
    %378 = vector.broadcast %377 : vector<8x1xf32> to vector<8x16xf32>
    %379 = arith.subf %371, %378 : vector<8x16xf32>
    %380 = arith.mulf %379, %379 : vector<8x16xf32>
    %cst_220 = arith.constant dense<0.000000e+00> : vector<8xf32>
    %381 = vector.multi_reduction <add>, %380, %cst_220 [1] : vector<8x16xf32> to vector<8xf32>
    %382 = vector.shape_cast %381 : vector<8xf32> to vector<8x1xf32>
    %cst_221 = arith.constant 1.600000e+01 : f32
    %383 = vector.broadcast %cst_221 : f32 to vector<8x1xf32>
    %384 = arith.divf %382, %383 : vector<8x1xf32>
    %385 = vector.broadcast %377 : vector<8x1xf32> to vector<8x16xf32>
    %386 = arith.subf %371, %385 : vector<8x16xf32>
    %cst_222 = arith.constant 9.99999997E-7 : f32
    %387 = vector.broadcast %cst_222 : f32 to vector<8x1xf32>
    %388 = arith.addf %384, %387 : vector<8x1xf32>
    %389 = math.rsqrt %388 : vector<8x1xf32>
    %390 = vector.broadcast %389 : vector<8x1xf32> to vector<8x16xf32>
    %391 = arith.mulf %386, %390 : vector<8x16xf32>
    %392 = vector.broadcast %372 : vector<1x16xf32> to vector<8x16xf32>
    %393 = arith.mulf %391, %392 : vector<8x16xf32>
    %394 = vector.broadcast %373 : vector<1x16xf32> to vector<8x16xf32>
    %395 = arith.addf %393, %394 : vector<8x16xf32>
    %cst_223 = arith.constant 0.000000e+00 : f32
    %396 = vector.broadcast %cst_223 : f32 to vector<8x112xf32>
    %397 = tpu.concatenate %395, %396 in 1 : vector<8x16xf32>, vector<8x112xf32> -> vector<8x128xf32>
    %c0_224 = arith.constant 0 : index
    %c0_225 = arith.constant 0 : index
    %398 = vector.load %arg24[%c0_224, %c0_225] : memref<8x128xf32, #tpu.memory_space<vmem>>, vector<8x128xf32>
    tpu.vector_store %arg24[%c0_224, %c0_225], %397 {strides = array<i32>} : memref<8x128xf32, #tpu.memory_space<vmem>>, vector<8x128xf32>,
    return
  }
}

</mosaic_0001>

<bundles_post_ra>
// kernel: _lambda_.1
= control target key start
LH: loop header
LB: loop body
LE: loop exit
PB: predicated region body
PF: predicated region fallthrough
CT: control target
= control target key end

     0   :  { %s2222_s0 = inlined_call_operand.vmem [shape: f32[8,256], index: 0, kind: input, shape index: {}]   ;;  %s2223_s1 = inlined_call_operand.vmem [shape: f32[8,32], index: 1, kind: input, shape index: {}]   ;;  %s2224_s2 = inlined_call_operand.vmem [shape: f32[256,32], index: 2, kind: input, shape index: {}]   ;;  %s2225_s3 = inlined_call_operand.vmem [shape: f32[1,32], index: 3, kind: input, shape index: {}]   ;;  %s2226_s4 = inlined_call_operand.vmem [shape: f32[8,8], index: 4, kind: input, shape index: {}]   ;;  %s2227_s5 = inlined_call_operand.vmem [shape: f32[2,1,32], index: 5, kind: input, shape index: {}, may-alias: {5,11}]   ;;  %s2228_s6 = inlined_call_operand.vmem [shape: f32[2,1,32], index: 6, kind: input, shape index: {}, may-alias: {6,12}]   ;;  %s2229_s7 = inlined_call_operand.vmem [shape: f32[2,32,96], index: 7, kind: input, shape index: {}]   ;;  %s2230_s8 = inlined_call_operand.vmem [shape: f32[2,1,96], index: 8, kind: input, shape index: {}]   ;;  %s2231_s9 = inlined_call_operand.vmem [shape: f32[2,32,32], index: 9, kind: input, shape index: {}]   ;;  %s2232_s10 = inlined_call_operand.vmem [shape: f32[2,1,32], index: 10, kind: input, shape index: {}]   ;;  %s2233_s11 = inlined_call_operand.vmem [shape: f32[2,1,32], index: 11, kind: input, shape index: {}, may-alias: {5,11}]   ;;  %s2234_s12 = inlined_call_operand.vmem [shape: f32[2,1,32], index: 12, kind: input, shape index: {}, may-alias: {6,12}]   ;;  %s2235_s13 = inlined_call_operand.vmem [shape: f32[2,32,128], index: 13, kind: input, shape index: {}]   ;;  %s2236_s14 = inlined_call_operand.vmem [shape: f32[2,1,128], index: 14, kind: input, shape index: {}]   ;;  %s2237_s15 = inlined_call_operand.vmem [shape: f32[2,128,32], index: 15, kind: input, shape index: {}]   ;;  %s2238_s16 = inlined_call_operand.vmem [shape: f32[2,1,32], index: 16, kind: input, shape index: {}]   ;;  %s2239_s17 = inlined_call_operand.vmem [shape: f32[32,16], index: 17, kind: input, shape index: {}]   ;;  %s2240_s18 = inlined_call_operand.vmem [shape: f32[1,16], index: 18, kind: input, shape index: {}, may-alias: {18,22}]   ;;  %s2241_s19 = inlined_call_operand.vmem [shape: f32[1,16], index: 19, kind: input, shape index: {}, may-alias: {19,23}]   ;;  %s2242_s20 = inlined_call_operand.vmem [shape: f32[9,16,16], index: 20, kind: input, shape index: {}]   ;;  %s2243_s21 = inlined_call_operand.vmem [shape: f32[9,8,1], index: 21, kind: input, shape index: {}]   ;;  %s2244_s22 = inlined_call_operand.vmem [shape: f32[1,16], index: 22, kind: input, shape index: {}, may-alias: {18,22}]   ;;  %s2245_s23 = inlined_call_operand.vmem [shape: f32[1,16], index: 23, kind: input, shape index: {}, may-alias: {19,23}]   ;;  %s2246_s24 = inlined_call_operand.hbm [shape: f32[8,128], index: 24, kind: output, shape index: {}]  }
   0x1   :  { %2258 = sst [smem:[#allocation6_spill]] %s2222_s0 }
   0x2   :  { %2259 = sst [smem:[#allocation7_spill]] %s2223_s1 }
   0x3   :  { %2260 = sst [smem:[#allocation8_spill]] %s2224_s2 }
   0x4   :  { %2261 = sst [smem:[#allocation9_spill]] %s2225_s3 }
   0x5   :  { %2262 = sst [smem:[#allocation10_spill]] %s2226_s4 }
   0x6   :  { %2263 = sst [smem:[#allocation11_spill]] %s2227_s5 }
   0x7   :  { %2264 = sst [smem:[#allocation12_spill]] %s2228_s6 }
   0x8   :  { %2265 = sst [smem:[#allocation13_spill]] %s2229_s7 }
   0x9   :  { %2266 = sst [smem:[#allocation14_spill]] %s2230_s8 }
   0xa   :  { %s2267_s27 = sld [smem:[#allocation8_spill]] }
  0x10   :  { %v95_v0 = vld [vmem:[%s2267_s27 + $0x78] sm:$0xff]  ;;  %v94_v1 = vld [vmem:[%s2267_s27 + $0x70] sm:$0xff]  ;;  %v93_v4 = vld [vmem:[%s2267_s27 + $0x68] sm:$0xff] }
  0x11   :  { %v111_v2 = vld [vmem:[%s2267_s27 + $0xf8] sm:$0xff]  ;;  %116 = vmatpush.msra.mxu0 %v95_v0  ;;  %v110_v3 = vld [vmem:[%s2267_s27 + $0xf0] sm:$0xff]  ;;  %v109_v5 = vld [vmem:[%s2267_s27 + $0xe8] sm:$0xff] }
  0x12   :  { %136 = vmatpush.msra.mxu1 %v111_v2  ;;  %v92_v6 = vld [vmem:[%s2267_s27 + $0x60] sm:$0xff]  ;;  %v91_v8 = vld [vmem:[%s2267_s27 + $0x58] sm:$0xff]  ;;  %v90_v10 = vld [vmem:[%s2267_s27 + $0x50] sm:$0xff] }
  0x13   :  { %117 = vmatpush.msra.mxu0 %v94_v1  ;;  %v108_v7 = vld [vmem:[%s2267_s27 + $0xe0] sm:$0xff]  ;;  %v107_v9 = vld [vmem:[%s2267_s27 + $0xd8] sm:$0xff]  ;;  %v106_v11 = vld [vmem:[%s2267_s27 + $0xd0] sm:$0xff] }
  0x14   :  { %137 = vmatpush.msra.mxu1 %v110_v3  ;;  %v89_v12 = vld [vmem:[%s2267_s27 + $0x48] sm:$0xff]  ;;  %v88_v14 = vld [vmem:[%s2267_s27 + $0x40] sm:$0xff]  ;;  %v87_v16 = vld [vmem:[%s2267_s27 + $0x38] sm:$0xff] }
  0x15   :  { %118 = vmatpush.msra.mxu0 %v93_v4  ;;  %v105_v13 = vld [vmem:[%s2267_s27 + $0xc8] sm:$0xff]  ;;  %v104_v15 = vld [vmem:[%s2267_s27 + $0xc0] sm:$0xff]  ;;  %v103_v17 = vld [vmem:[%s2267_s27 + $0xb8] sm:$0xff] }
  0x16   :  { %138 = vmatpush.msra.mxu1 %v109_v5  ;;  %v86_v18 = vld [vmem:[%s2267_s27 + $0x30] sm:$0xff]  ;;  %v85_v20 = vld [vmem:[%s2267_s27 + $0x28] sm:$0xff] }
  0x17   :  { %119 = vmatpush.msra.mxu0 %v92_v6  ;;  %v102_v19 = vld [vmem:[%s2267_s27 + $0xb0] sm:$0xff]  ;;  %v101_v21 = vld [vmem:[%s2267_s27 + $0xa8] sm:$0xff] }
  0x18   :  { %139 = vmatpush.msra.mxu1 %v108_v7 }
  0x19   :  { %120 = vmatpush.msra.mxu0 %v91_v8 }
  0x1a   :  { %140 = vmatpush.msra.mxu1 %v107_v9 }
  0x1b   :  { %121 = vmatpush.msra.mxu0 %v90_v10 }
  0x1c   :  { %141 = vmatpush.msra.mxu1 %v106_v11 }
  0x1d   :  { %122 = vmatpush.msra.mxu0 %v89_v12 }
  0x1e   :  { %142 = vmatpush.msra.mxu1 %v105_v13 }
  0x1f   :  { %123 = vmatpush.msra.mxu0 %v88_v14 }
  0x20   :  { %143 = vmatpush.msra.mxu1 %v104_v15 }
  0x21   :  { %124 = vmatpush.msra.mxu0 %v87_v16 }
  0x22   :  { %144 = vmatpush.msra.mxu1 %v103_v17 }
  0x23   :  { %29 = vsyncpa [#allocation4], 0  ;;  %125 = vmatpush.msra.mxu0 %v86_v18  ;;  %v84_v22 = vld [vmem:[%s2267_s27 + $0x20] sm:$0xff]  ;;  %v83_v24 = vld [vmem:[%s2267_s27 + $0x18] sm:$0xff]  ;;  %s2268_s25 = sld [smem:[#allocation6_spill]]  ;;  %vm161_vm0 = vcmask 261120  }
  0x24   :  { %145 = vmatpush.msra.mxu1 %v102_v19  ;;  %v100_v23 = vld [vmem:[%s2267_s27 + $0xa0] sm:$0xff]  ;;  %v99_v25 = vld [vmem:[%s2267_s27 + $0x98] sm:$0xff]  ;;  %v82_v26 = vld [vmem:[%s2267_s27 + $0x10] sm:$0xff]  ;;  %s2269_s26 = sld [smem:[#allocation9_spill]]  ;;  %v1539_v42 = vmov 32.0   ;;  %s2255_s30 = smov 112  }
  0x25   :  { %126 = vmatpush.msra.mxu0 %v85_v20  ;;  %v98_v27 = vld [vmem:[%s2267_s27 + $0x90] sm:$0xff]  ;;  %v81_v28 = vld [vmem:[%s2267_s27 + $0x8] sm:$0xff]  ;;  %v80_v30 = vld [vmem:[%s2267_s27] sm:$0xff]  ;;  %s2270_s6 = sld [smem:[#allocation7_spill]]  ;;  %1477 = vrcp.f32 %v1539_v42  ;;  %s1541_s3 = smov 96   ;;  %vm233_vm5 = vcmask 130048  }
  0x26   :  { %146 = vmatpush.msra.mxu1 %v101_v21  ;;  %v97_v29 = vld [vmem:[%s2267_s27 + $0x88] sm:$0xff]  ;;  %v96_v31 = vld [vmem:[%s2267_s27 + $0x80] sm:$0xff]  ;;  %s2271_s0 = sld [smem:[#allocation13_spill]]  ;;  %vm258_vm6 = vcmask 64512   ;;  %s2254_s5 = smov 48   ;;  %vm392_vm15 = vcmask 261248  }
  0x27   :  { %127 = vmatpush.msra.mxu0 %v84_v22  ;;  %s2274_s7 = sld [smem:[#allocation14_spill]]  ;;  %s2253_s27 = smov 64  }
  0x28   :  { %147 = vmatpush.msra.mxu1 %v100_v23  ;;  %s2275_s1 = sld [smem:[#allocation10_spill]]  ;;  %s2256_s28 = smov 16  }
  0x29   :  { %128 = vmatpush.msra.mxu0 %v83_v24  ;;  %v78_v32 = vld [vmem:[%s2268_s25] sm:$0xff]  ;;  %v79_v33 = vld [vmem:[%s2268_s25 + $0x8] sm:$0xff]  ;;  %s2257_s25 = smov 80  }
  0x2a   :  { %148 = vmatpush.msra.mxu1 %v99_v25  ;;  %v1456_v34 = vld [vmem:[%s2269_s26] ss:$0 sm:$0xff]  ;;  %s2272_s26 = sld [smem:[#allocation11_spill]] }
  0x2b   :  { %129 = vmatpush.msra.mxu0 %v82_v26  ;;  %v156_v38 = vld [vmem:[%s2270_s6] sm:$0xff]  ;;  %v1478_v43 = vpop.eup %1477  ;;  %s2273_s6 = sld [smem:[#allocation12_spill]] }
  0x2c   :  { %149 = vmatpush.msra.mxu1 %v98_v27  ;;  %v166_v44 = vmul.f32 32.0, %v1478_v43  ;;  %vm170_vm1 = vweird.f32 %v1478_v43  ;;  %v202_v54 = vld [vmem:[%s2271_s0 + $0x18] sm:$0xff]  ;;  %v201_v55 = vld [vmem:[%s2271_s0 + $0x10] sm:$0xff]  ;;  %v200_v56 = vld [vmem:[%s2271_s0 + $0x8] sm:$0xff] }
  0x2d   :  { %130 = vmatpush.msra.mxu0 %v81_v28  ;;  %222 = vmatpush.msra.mxu2 %v202_v54  ;;  %v199_v57 = vld [vmem:[%s2271_s0] sm:$0xff] }
  0x2e   :  { %150 = vmatpush.msra.mxu1 %v97_v29  ;;  %v167_v45 = vsub.f32 1.0, %v166_v44  ;;  %v1459_v9 = vld [vmem:[%s2274_s7] ss:$0 sm:$0xff] }
  0x2f   :  { %131 = vmatpush.msra.mxu0 %v80_v30  ;;  %223 = vmatpush.msra.mxu2 %v201_v55  ;;  %v1824_v15 = vld [vmem:[%s2275_s1] sm:$0xff] }
  0x30   :  { %151 = vmatpush.msra.mxu1 %v96_v31  ;;  %132 = vmatmul.f32.vlgmr.msra.gmra.mxu0 %v78_v32  ;;  %v168_v46 = vmul.f32 %v1478_v43, %v167_v45  ;;  %v1457_v3 = vld [vmem:[%s2272_s26] ss:$0 sm:$0xff] }
  0x31   :  { %152 = vmatmul.f32.vlgmr.msra.gmra.mxu1 %v79_v33  ;;  %224 = vmatpush.msra.mxu2 %v200_v56  ;;  %v1458_v6 = vld [vmem:[%s2273_s6] ss:$0 sm:$0xff] }
  0x32   :  { %v169_v47 = vadd.f32 %v1478_v43, %v168_v46 }
  0x33   :  { %225 = vmatpush.msra.mxu2 %v199_v57 }
  0x34   :  { %v1786_v48 = vsel %vm170_vm1, %v1478_v43, %v169_v47 }
  0xad   :  { %v133_v35 = vpop.f32.mrf.mxu0 }
  0xae   :  { %v153_v36 = vpop.f32.mrf.mxu1  ;;  %v134_v37 = vadd.f32 %v1456_v34, %v133_v35 }
  0xb0   :  { %v154_v39 = vadd.f32 %v153_v36, %v134_v37 }
  0xb2   :  { %v1782_v40 = vadd.f32 %v156_v38, %v154_v39 }
  0xb4   :  { %v162_v41 = vsel %vm161_vm0, %v1782_v40, 0.0 }
  0xb5   :  { %163 = vadd.xlane.f32.xlu0 %v162_v41 }
 0x128   :  { %v164_v49 = vpop.xlane.xlu0 %163 }
 0x129   :  { %v172_v50 = vmul.f32 %v1786_v48, %v164_v49 }
 0x12b   :  { %v173_v51 = vsub.f32 %v1782_v40, %v172_v50 }
 0x12d   :  { %v174_v52 = vmul.f32 %v173_v51, %v173_v51 }
 0x12f   :  { %v175_v53 = vsel %vm161_vm0, %v174_v52, 0.0 }
 0x130   :  { %176 = vadd.xlane.f32.xlu0 %v175_v53 }
 0x1a3   :  { %v177_v58 = vpop.xlane.xlu0 %176 }
 0x1a4   :  { %v178_v59 = vmul.f32 %v177_v58, %v1786_v48 }
 0x1a6   :  { %v179_v60 = vadd.f32 1e-06, %v178_v59 }
 0x1a8   :  { %1479 = vrsqrt.f32 %v179_v60  ;;  %vm186_vm3 = vweird.f32 %v179_v60 }
 0x1ae   :  { %v1480_v61 = vpop.eup %1479 }
 0x1af   :  { %v181_v62 = vmul.f32 %v1480_v61, %v179_v60  ;;  %vm187_vm2 = vweird.f32 %v1480_v61 }
 0x1b0   :  { %vm188_vm4 = vmor %vm186_vm3, %vm187_vm2 }
 0x1b1   :  { %v182_v63 = vmul.f32 %v1480_v61, %v181_v62  ;;  %v398_v62 = vld [vmem:[%s2231_s9 + $0x18] sm:$0xff] }
 0x1b3   :  { %v183_v0 = vmul.f32 0.5, %v182_v63  ;;  %v397_v63 = vld [vmem:[%s2231_s9 + $0x10] sm:$0xff] }
 0x1b5   :  { %v184_v1 = vsub.f32 1.5, %v183_v0  ;;  %v396_v0 = vld [vmem:[%s2231_s9 + $0x8] sm:$0xff] }
 0x1b7   :  { %v185_v2 = vmul.f32 %v1480_v61, %v184_v1  ;;  %v395_v1 = vld [vmem:[%s2231_s9] sm:$0xff] }
 0x1b9   :  { %v189_v4 = vsel %vm188_vm4, %v1480_v61, %v185_v2 }
 0x1ba   :  { %v190_v5 = vmul.f32 %v189_v4, %v173_v51  ;;  %v1460_v4 = vld [vmem:[%s2232_s10] ss:$0 sm:$0xff] }
 0x1bc   :  { %v194_v7 = vmul.f32 %v1457_v3, %v190_v5 }
 0x1be   :  { %v198_v8 = vadd.f32 %v1458_v6, %v194_v7 }
 0x1c0   :  { %1355 = vmatmul.msk.f32.vlgmr.msra.gmra.mxu2 %vm161_vm0, %v198_v8 }
 0x243   :  { %v227_v10 = vpop.f32.mrf.mxu2 }
 0x244   :  { %v228_v11 = vadd.f32 %v1459_v9, %v227_v10 }
 0x246   :  { %310 = vrot.lane.b32.xlu2 %v228_v11, %s2255_s30  ;;  %231 = vrot.lane.b32.xlu1 %v228_v11, %s1541_s3 }
 0x24e   :  { %312 = vrot.lane.b32.xlu1 %v228_v11, %s2257_s25 }
 0x2a0   :  { %v311_v14 = vpop.permute.xlu2 %310 }
 0x2b8   :  { %v232_v12 = vpop.permute.xlu1 %231 }
 0x2b9   :  { %1356 = vmatpush.xpose.msk.msra.mxu3 %vm233_vm5, %v232_v12 }
 0x2bc   :  { %1357 = vmatmul.msk.f32.vlgmr.msra.gmra.mxu3 %vm233_vm5, %v228_v11 }
 0x2c0   :  { %v313_v13 = vpop.permute.xlu1 %312 }
 0x2c1   :  { %1359 = vmatpush.xpose.msk.msrb.mxu2 %vm233_vm5, %v313_v13 }
 0x2c4   :  { %1360 = vmatmul.msk.f32.vlgmr.msrb.gmra.mxu2 %vm233_vm5, %v311_v14  ;;  %v462_v14 = vld [vmem:[%s2235_s13 + $0x18] sm:$0xff] }
 0x2c5   :  { %418 = vmatpush.msra.mxu2 %v398_v62 }
 0x2c7   :  { %419 = vmatpush.msra.mxu2 %v397_v63  ;;  %v1464_v63 = vld [vmem:[%s2238_s16] ss:$0 sm:$0xff] }
 0x2c9   :  { %420 = vmatpush.msra.mxu2 %v396_v0 }
 0x2cb   :  { %421 = vmatpush.msra.mxu2 %v395_v1 }
 0x33f   :  { %v255_v16 = vpop.f32.mrf.mxu3 }
 0x340   :  { %v256_v17 = vadd.f32 %v255_v16, %v1824_v15  ;;  %v460_v16 = vld [vmem:[%s2235_s13 + $0x8] sm:$0xff] }
 0x342   :  { %v259_v18 = vsel %vm258_vm6, %v256_v17, -inf }
 0x343   :  { %260 = vmax.xlane.f32.xlu2 %v259_v18  ;;  %v514_v18 = vld [vmem:[%s2237_s15 + $0x78] sm:$0xff] }
 0x344   :  { %519 = vmatpush.msrb.mxu2 %v514_v18 }
 0x347   :  { %v335_v19 = vpop.f32.mrf.mxu2 }
 0x348   :  { %v336_v20 = vadd.f32 %v335_v19, %v1824_v15  ;;  %v513_v19 = vld [vmem:[%s2237_s15 + $0x70] sm:$0xff] }
 0x349   :  { %520 = vmatpush.msrb.mxu2 %v513_v19 }
 0x34a   :  { %v338_v21 = vsel %vm258_vm6, %v336_v20, -inf }
 0x34b   :  { %339 = vmax.xlane.f32.xlu0 %v338_v21 }
 0x35b   :  { %362 = vrot.lane.b32.xlu2 %v228_v11, %s2254_s5  ;;  %s2277_s5 = smov 112  }
 0x3b6   :  { %v261_v22 = vpop.xlane.xlu2 %260 }
 0x3b7   :  { %v262_v23 = vsub.f32 %v256_v17, %v261_v22  ;;  %v459_v17 = vld [vmem:[%s2235_s13] sm:$0xff] }
 0x3b9   :  { %v263_v24 = vmul.f32 1.442695, %v262_v23 }
 0x3bb   :  { %1481 = vpow2.f32 %v263_v24 }
 0x3be   :  { %v340_v25 = vpop.xlane.xlu0 %339  ;;  %v363_v55 = vpop.permute.xlu2 %362 }
 0x3bf   :  { %v341_v26 = vsub.f32 %v336_v20, %v340_v25  ;;  %v512_v20 = vld [vmem:[%s2237_s15 + $0x68] sm:$0xff] }
 0x3c0   :  { %521 = vmatpush.msrb.mxu2 %v512_v20 }
 0x3c1   :  { %v1482_v27 = vpop.eup %1481  ;;  %v342_v28 = vmul.f32 1.442695, %v341_v26 }
 0x3c2   :  { %v265_v29 = vsel %vm258_vm6, %v1482_v27, 0.0 }
 0x3c3   :  { %1483 = vpow2.f32 %v342_v28  ;;  %266 = vadd.xlane.f32.xlu1 %v265_v29 }
 0x3c9   :  { %v1484_v30 = vpop.eup %1483 }
 0x3ca   :  { %v344_v31 = vsel %vm258_vm6, %v1484_v30, 0.0 }
 0x3cb   :  { %345 = vadd.xlane.f32.xlu0 %v344_v31 }
 0x3df   :  { %283 = vrot.lane.b32.xlu0 %v228_v11, %s2253_s27 }
 0x436   :  { %v267_v32 = vpop.xlane.xlu1 %266 }
 0x437   :  { %1485 = vrcp.f32 %v267_v32  ;;  %v279_v42 = vand.u32 2147483648, %v267_v32  ;;  %vm273_vm8 = vweird.f32 %v267_v32  ;;  %v277_v44 = vand.u32 2147483647, %v267_v32 }
 0x439   :  { %v280_v47 = vor.u32 1.1754944e-38, %v279_v42  ;;  %vm278_vm10 = vcmp.eq.f32.partialorder %v277_v44, 8.507059e+37  ;;  %v506_v42 = vld [vmem:[%s2237_s15 + $0x38] sm:$0xff]  ;;  %v504_v44 = vld [vmem:[%s2237_s15 + $0x28] sm:$0xff] }
 0x43d   :  { %v1486_v33 = vpop.eup %1485 }
 0x43e   :  { %v269_v34 = vmul.f32 %v1486_v33, %v267_v32  ;;  %v346_v35 = vpop.xlane.xlu0 %345  ;;  %vm274_vm7 = vweird.f32 %v1486_v33 }
 0x43f   :  { %1487 = vrcp.f32 %v346_v35  ;;  %vm275_vm9 = vmor %vm273_vm8, %vm274_vm7  ;;  %v358_v51 = vand.u32 2147483648, %v346_v35  ;;  %vm352_vm12 = vweird.f32 %v346_v35  ;;  %v356_v52 = vand.u32 2147483647, %v346_v35 }
 0x440   :  { %v270_v36 = vsub.f32 1.0, %v269_v34 }
 0x441   :  { %v359_v57 = vor.u32 1.1754944e-38, %v358_v51  ;;  %vm357_vm14 = vcmp.eq.f32.partialorder %v356_v52, 8.507059e+37  ;;  %v1463_v51 = vld [vmem:[%s2236_s14] ss:$0 sm:$0xff] }
 0x442   :  { %v271_v37 = vmul.f32 %v1486_v33, %v270_v36  ;;  %v511_v36 = vld [vmem:[%s2237_s15 + $0x60] sm:$0xff] }
 0x443   :  { %522 = vmatpush.msrb.mxu2 %v511_v36 }
 0x444   :  { %v272_v41 = vadd.f32 %v1486_v33, %v271_v37  ;;  %v510_v37 = vld [vmem:[%s2237_s15 + $0x58] sm:$0xff] }
 0x445   :  { %v1488_v38 = vpop.eup %1487  ;;  %523 = vmatpush.msrb.mxu2 %v510_v37 }
 0x446   :  { %v348_v39 = vmul.f32 %v1488_v38, %v346_v35  ;;  %v276_v46 = vsel %vm275_vm9, %v1486_v33, %v272_v41  ;;  %vm353_vm11 = vweird.f32 %v1488_v38  ;;  %v1462_v33 = vld [vmem:[%s2234_s12] ss:$0 sm:$0xff] }
 0x447   :  { %v281_v49 = vsel %vm278_vm10, %v280_v47, %v276_v46  ;;  %vm354_vm13 = vmor %vm352_vm12, %vm353_vm11  ;;  %v507_v41 = vld [vmem:[%s2237_s15 + $0x40] sm:$0xff]  ;;  %v502_v46 = vld [vmem:[%s2237_s15 + $0x18] sm:$0xff] }
 0x448   :  { %v349_v43 = vsub.f32 1.0, %v348_v39  ;;  %v282_v54 = vmul.f32 %v1482_v27, %v281_v49  ;;  %v508_v39 = vld [vmem:[%s2237_s15 + $0x48] sm:$0xff]  ;;  %v501_v47 = vld [vmem:[%s2237_s15 + $0x10] sm:$0xff] }
 0x449   :  { %v500_v49 = vld [vmem:[%s2237_s15 + $0x8] sm:$0xff] }
 0x44a   :  { %v350_v45 = vmul.f32 %v1488_v38, %v349_v43  ;;  %v505_v43 = vld [vmem:[%s2237_s15 + $0x30] sm:$0xff] }
 0x44c   :  { %v351_v50 = vadd.f32 %v1488_v38, %v350_v45  ;;  %v503_v45 = vld [vmem:[%s2237_s15 + $0x20] sm:$0xff] }
 0x44e   :  { %v355_v56 = vsel %vm354_vm13, %v1488_v38, %v351_v50  ;;  %v509_v38 = vld [vmem:[%s2237_s15 + $0x50] sm:$0xff]  ;;  %v499_v50 = vld [vmem:[%s2237_s15] sm:$0xff] }
 0x44f   :  { %v360_v58 = vsel %vm357_vm14, %v359_v57, %v355_v56  ;;  %524 = vmatpush.msrb.mxu2 %v509_v38 }
 0x450   :  { %v361_v59 = vmul.f32 %v1484_v30, %v360_v58  ;;  %v1461_v30 = vld [vmem:[%s2233_s11] ss:$0 sm:$0xff] }
 0x451   :  { %v284_v53 = vpop.permute.xlu0 %283  ;;  %525 = vmatpush.msrb.mxu2 %v508_v39 }
 0x452   :  { %304 = vmatpush.msrb.mxu3 %v284_v53 }
 0x453   :  { %1358 = vmatmul.msk.f32.vlgmr.msrb.gmra.mxu3 %vm258_vm6, %v282_v54  ;;  %526 = vmatpush.msrb.mxu2 %v507_v41 }
 0x454   :  { %383 = vmatpush.msra.mxu3 %v363_v55 }
 0x455   :  { %527 = vmatpush.msrb.mxu2 %v506_v42 }
 0x456   :  { %482 = vmatpush.msrb.mxu3 %v462_v14 }
 0x457   :  { %528 = vmatpush.msrb.mxu2 %v505_v43 }
 0x459   :  { %529 = vmatpush.msrb.mxu2 %v504_v44 }
 0x45b   :  { %1361 = vmatmul.msk.f32.vlgmr.msra.gmra.mxu3 %vm258_vm6, %v361_v59  ;;  %530 = vmatpush.msrb.mxu2 %v503_v45 }
 0x45d   :  { %531 = vmatpush.msrb.mxu2 %v502_v46 }
 0x45f   :  { %532 = vmatpush.msrb.mxu2 %v501_v47 }
 0x461   :  { %533 = vmatpush.msrb.mxu2 %v500_v49 }
 0x463   :  { %534 = vmatpush.msrb.mxu2 %v499_v50 }
 0x4d6   :  { %v306_v60 = vpop.f32.mrf.mxu3 }
 0x4d7   :  { %309 = vst.msk [vmem:[#allocation2] sm:$0xff] %vm233_vm5, %v306_v60 }
 0x4de   :  { %v385_v61 = vpop.f32.mrf.mxu3 }
 0x4df   :  { %389 = vrot.lane.b32.xlu0 %v385_v61, %s2256_s28 }
 0x551   :  { %v390_v2 = vpop.permute.xlu0 %389 }
 0x552   :  { %393 = vst.msk [vmem:[#allocation2] sm:$0xff] %vm392_vm15, %v390_v2 }
 0x559   :  { %v394_v3 = vld [vmem:[#allocation2] sm:$0xff] }
 0x55a   :  { %1362 = vmatmul.msk.f32.vlgmr.msra.gmra.mxu2 %vm161_vm0, %v394_v3 }
 0x5dd   :  { %v423_v5 = vpop.f32.mrf.mxu2 }
 0x5de   :  { %v424_v6 = vadd.f32 %v1460_v4, %v423_v5 }
 0x5e0   :  { %v1856_v7 = vadd.f32 %v424_v6, %v1782_v40  ;;  %v461_v40 = vld [vmem:[%s2235_s13 + $0x10] sm:$0xff] }
 0x5e1   :  { %483 = vmatpush.msrb.mxu3 %v461_v40 }
 0x5e2   :  { %v429_v8 = vsel %vm161_vm0, %v1856_v7, 0.0 }
 0x5e3   :  { %430 = vadd.xlane.f32.xlu1 %v429_v8  ;;  %484 = vmatpush.msrb.mxu3 %v460_v16 }
 0x5e5   :  { %485 = vmatpush.msrb.mxu3 %v459_v17 }
 0x656   :  { %v431_v9 = vpop.xlane.xlu1 %430 }
 0x657   :  { %v432_v10 = vmul.f32 %v431_v9, %v1786_v48 }
 0x659   :  { %v433_v11 = vsub.f32 %v1856_v7, %v432_v10  ;;  %v1369_v10 = vld [vmem:[%s2271_s0 + $0x38] sm:$0xff] }
 0x65a   :  { %599 = vmatpush.msra.mxu3 %v1369_v10 }
 0x65b   :  { %v434_v12 = vmul.f32 %v433_v11, %v433_v11 }
 0x65d   :  { %v435_v13 = vsel %vm161_vm0, %v434_v12, 0.0  ;;  %v1366_v12 = vld [vmem:[%s2271_s0 + $0x20] sm:$0xff] }
 0x65e   :  { %436 = vadd.xlane.f32.xlu0 %v435_v13 }
 0x6d1   :  { %v437_v21 = vpop.xlane.xlu0 %436 }
 0x6d2   :  { %v438_v22 = vmul.f32 %v437_v21, %v1786_v48 }
 0x6d4   :  { %v439_v23 = vadd.f32 1e-06, %v438_v22  ;;  %v1465_v22 = vld [vmem:[%s2272_s26 + $0x1] ss:$0 sm:$0xff]  ;;  %s2276_s26 = smov 80  }
 0x6d6   :  { %1489 = vrsqrt.f32 %v439_v23  ;;  %vm446_vm2 = vweird.f32 %v439_v23 }
 0x6dc   :  { %v1490_v24 = vpop.eup %1489 }
 0x6dd   :  { %v441_v25 = vmul.f32 %v1490_v24, %v439_v23  ;;  %vm447_vm1 = vweird.f32 %v1490_v24 }
 0x6de   :  { %vm448_vm3 = vmor %vm446_vm2, %vm447_vm1 }
 0x6df   :  { %v442_v26 = vmul.f32 %v1490_v24, %v441_v25  ;;  %v1466_v25 = vld [vmem:[%s2273_s6 + $0x1] ss:$0 sm:$0xff]  ;;  %s2278_s6 = smov 48  }
 0x6e1   :  { %v443_v27 = vmul.f32 0.5, %v442_v26 }
 0x6e3   :  { %v444_v28 = vsub.f32 1.5, %v443_v27 }
 0x6e5   :  { %v445_v29 = vmul.f32 %v1490_v24, %v444_v28  ;;  %v1467_v28 = vld [vmem:[%s2274_s7 + $0x1] ss:$0 sm:$0xff]  ;;  %s2279_s7 = smov 64  }
 0x6e7   :  { %v449_v31 = vsel %vm448_vm3, %v1490_v24, %v445_v29 }
 0x6e8   :  { %v450_v32 = vmul.f32 %v449_v31, %v433_v11  ;;  %v1367_v11 = vld [vmem:[%s2271_s0 + $0x28] sm:$0xff] }
 0x6ea   :  { %v454_v34 = vmul.f32 %v1461_v30, %v450_v32 }
 0x6ec   :  { %v458_v35 = vadd.f32 %v1462_v33, %v454_v34 }
 0x6ee   :  { %1363 = vmatmul.msk.f32.vlgmr.msrb.gmra.mxu3 %vm161_vm0, %v458_v35 }
 0x771   :  { %v487_v52 = vpop.f32.mrf.mxu3 }
 0x772   :  { %v488_v53 = vadd.f32 %v1463_v51, %v487_v52 }
 0x774   :  { %v490_v54 = vmul.f32 %v488_v53, %v488_v53 }
 0x776   :  { %v491_v55 = vmul.f32 %v490_v54, %v488_v53 }
 0x778   :  { %v492_v56 = vmul.f32 0.044715, %v491_v55 }
 0x77a   :  { %v493_v57 = vadd.f32 %v492_v56, %v488_v53 }
 0x77c   :  { %v494_v58 = vmul.f32 0.7978846, %v493_v57 }
 0x77e   :  { %1491 = vtanh.f32 %v494_v58 }
 0x784   :  { %v1492_v59 = vpop.eup %1491 }
 0x785   :  { %v496_v60 = vadd.f32 1.0, %v1492_v59 }
 0x787   :  { %v497_v61 = vmul.f32 0.5, %v496_v60 }
 0x789   :  { %v498_v62 = vmul.f32 %v497_v61, %v488_v53 }
 0x78b   :  { %535 = vmatmul.f32.vlgmr.msrb.gmra.mxu2 %v498_v62 }
 0x80e   :  { %v536_v0 = vpop.f32.mrf.mxu2 }
 0x80f   :  { %v537_v1 = vadd.f32 %v1464_v63, %v536_v0 }
 0x811   :  { %v1938_v2 = vadd.f32 %v537_v1, %v1856_v7  ;;  %v1368_v7 = vld [vmem:[%s2271_s0 + $0x30] sm:$0xff] }
 0x812   :  { %600 = vmatpush.msra.mxu3 %v1368_v7 }
 0x813   :  { %v544_v3 = vsel %vm161_vm0, %v1938_v2, 0.0 }
 0x814   :  { %545 = vadd.xlane.f32.xlu1 %v544_v3  ;;  %601 = vmatpush.msra.mxu3 %v1367_v11 }
 0x816   :  { %602 = vmatpush.msra.mxu3 %v1366_v12 }
 0x887   :  { %v546_v4 = vpop.xlane.xlu1 %545 }
 0x888   :  { %v547_v5 = vmul.f32 %v546_v4, %v1786_v48 }
 0x88a   :  { %v548_v6 = vsub.f32 %v1938_v2, %v547_v5 }
 0x88c   :  { %v549_v8 = vmul.f32 %v548_v6, %v548_v6 }
 0x88e   :  { %v550_v9 = vsel %vm161_vm0, %v549_v8, 0.0 }
 0x88f   :  { %551 = vadd.xlane.f32.xlu2 %v550_v9 }
 0x902   :  { %v552_v13 = vpop.xlane.xlu2 %551 }
 0x903   :  { %v553_v14 = vmul.f32 %v552_v13, %v1786_v48 }
 0x905   :  { %v554_v40 = vadd.f32 1e-06, %v553_v14 }
 0x907   :  { %1493 = vrsqrt.f32 %v554_v40  ;;  %vm561_vm7 = vweird.f32 %v554_v40 }
 0x90d   :  { %v1494_v16 = vpop.eup %1493 }
 0x90e   :  { %v556_v17 = vmul.f32 %v1494_v16, %v554_v40  ;;  %vm562_vm4 = vweird.f32 %v1494_v16 }
 0x90f   :  { %vm563_vm8 = vmor %vm561_vm7, %vm562_vm4 }
 0x910   :  { %v557_v18 = vmul.f32 %v1494_v16, %v556_v17  ;;  %v1380_v17 = vld [vmem:[%s2231_s9 + $0x30] sm:$0xff] }
 0x912   :  { %v558_v19 = vmul.f32 0.5, %v557_v18  ;;  %v1379_v18 = vld [vmem:[%s2231_s9 + $0x28] sm:$0xff] }
 0x914   :  { %v559_v20 = vsub.f32 1.5, %v558_v19  ;;  %v1378_v19 = vld [vmem:[%s2231_s9 + $0x20] sm:$0xff] }
 0x916   :  { %v560_v21 = vmul.f32 %v1494_v16, %v559_v20 }
 0x918   :  { %v564_v23 = vsel %vm563_vm8, %v1494_v16, %v560_v21  ;;  %v1381_v16 = vld [vmem:[%s2231_s9 + $0x38] sm:$0xff] }
 0x919   :  { %v565_v24 = vmul.f32 %v564_v23, %v548_v6 }
 0x91b   :  { %v569_v26 = vmul.f32 %v1465_v22, %v565_v24  ;;  %v1468_v22 = vld [vmem:[%s2232_s10 + $0x1] ss:$0 sm:$0xff] }
 0x91d   :  { %v573_v27 = vadd.f32 %v1466_v25, %v569_v26 }
 0x91f   :  { %1371 = vmatmul.msk.f32.vlgmr.msra.gmra.mxu3 %vm161_vm0, %v573_v27 }
 0x9a2   :  { %v604_v29 = vpop.f32.mrf.mxu3 }
 0x9a3   :  { %v605_v30 = vadd.f32 %v1467_v28, %v604_v29 }
 0x9a5   :  { %608 = vrot.lane.b32.xlu0 %v605_v30, %s1541_s3  ;;  %687 = vrot.lane.b32.xlu1 %v605_v30, %s2276_s26  ;;  %s2280_s3 = smov 16  }
 0x9ad   :  { %685 = vrot.lane.b32.xlu1 %v605_v30, %s2277_s5  ;;  %s1548_s5 = smov [#allocation3]  }
 0xa17   :  { %v609_v31 = vpop.permute.xlu0 %608  ;;  %v688_v32 = vpop.permute.xlu1 %687 }
 0xa18   :  { %1372 = vmatpush.xpose.msk.msrb.mxu0 %vm233_vm5, %v609_v31  ;;  %1375 = vmatpush.xpose.msk.msrb.mxu3 %vm233_vm5, %v688_v32  ;;  %v1389_v32 = vld [vmem:[%s2235_s13 + $0x38] sm:$0xff] }
 0xa1b   :  { %1373 = vmatmul.msk.f32.vlgmr.msrb.gmra.mxu0 %vm233_vm5, %v605_v30 }
 0xa1c   :  { %862 = vmatpush.msra.mxu3 %v1389_v32  ;;  %v1423_v32 = vld [vmem:[%s2243_s21 + $0x20] sm:$0xff] }
 0xa1f   :  { %v686_v33 = vpop.permute.xlu1 %685 }
 0xa20   :  { %1376 = vmatmul.msk.f32.vlgmr.msrb.gmra.mxu3 %vm233_vm5, %v686_v33  ;;  %v1387_v33 = vld [vmem:[%s2235_s13 + $0x28] sm:$0xff] }
 0xa98   :  { %v631_v34 = vpop.f32.mrf.mxu0 }
 0xa99   :  { %v632_v35 = vadd.f32 %v631_v34, %v1824_v15  ;;  %v1386_v34 = vld [vmem:[%s2235_s13 + $0x20] sm:$0xff] }
 0xa9b   :  { %v634_v36 = vsel %vm258_vm6, %v632_v35, -inf }
 0xa9c   :  { %635 = vmax.xlane.f32.xlu2 %v634_v36  ;;  %v1406_v36 = vld [vmem:[%s2237_s15 + $0xf0] sm:$0xff] }
 0xaa3   :  { %v710_v37 = vpop.f32.mrf.mxu3 }
 0xaa4   :  { %v711_v38 = vadd.f32 %v710_v37, %v1824_v15  ;;  %v1405_v37 = vld [vmem:[%s2237_s15 + $0xe8] sm:$0xff] }
 0xaa6   :  { %v713_v39 = vsel %vm258_vm6, %v711_v38, -inf }
 0xaa7   :  { %714 = vmax.xlane.f32.xlu1 %v713_v39 }
 0xab4   :  { %737 = vrot.lane.b32.xlu2 %v605_v30, %s2278_s6 }
 0xac0   :  { %658 = vrot.lane.b32.xlu1 %v605_v30, %s2279_s7  ;;  %s1346_s7 = sshll.u32 %s2246_s24, 4  ;;  %s1347_s7 = int_to_ptr.hbm [resolvable:$true] %s1346_s7 }
 0xb0f   :  { %v636_v41 = vpop.xlane.xlu2 %635 }
 0xb10   :  { %v637_v42 = vsub.f32 %v632_v35, %v636_v41  ;;  %v1407_v35 = vld [vmem:[%s2237_s15 + $0xf8] sm:$0xff] }
 0xb12   :  { %v638_v43 = vmul.f32 1.442695, %v637_v42 }
 0xb14   :  { %1495 = vpow2.f32 %v638_v43 }
 0xb17   :  { %v738_v44 = vpop.permute.xlu2 %737 }
 0xb18   :  { %758 = vmatpush.msra.mxu0 %v738_v44 }
 0xb1a   :  { %v1496_v45 = vpop.eup %1495  ;;  %v715_v46 = vpop.xlane.xlu1 %714  ;;  %901 = vmatpush.msrb.mxu0 %v1407_v35 }
 0xb1b   :  { %v716_v47 = vsub.f32 %v711_v38, %v715_v46  ;;  %v640_v49 = vsel %vm258_vm6, %v1496_v45, 0.0 }
 0xb1c   :  { %641 = vadd.xlane.f32.xlu2 %v640_v49  ;;  %902 = vmatpush.msrb.mxu0 %v1406_v36  ;;  %v1469_v49 = vld [vmem:[%s2233_s11 + $0x1] ss:$0 sm:$0xff]  ;;  %s1344_s11 = sshll.u32 %s1548_s5, 4  ;;  %s1345_s11 = int_to_ptr.vmem [resolvable:$true] %s1344_s11 }
 0xb1d   :  { %v717_v15 = vmul.f32 1.442695, %v716_v47 }
 0xb1e   :  { %903 = vmatpush.msrb.mxu0 %v1405_v37 }
 0xb1f   :  { %1497 = vpow2.f32 %v717_v15 }
 0xb25   :  { %v1498_v50 = vpop.eup %1497 }
 0xb26   :  { %v719_v51 = vsel %vm258_vm6, %v1498_v50, 0.0 }
 0xb27   :  { %720 = vadd.xlane.f32.xlu0 %v719_v51 }
 0xb32   :  { %v659_v52 = vpop.permute.xlu1 %658 }
 0xb33   :  { %679 = vmatpush.msrb.mxu1 %v659_v52 }
 0xb35   :  { %794 = vmatpush.msra.mxu1 %v1381_v16  ;;  %v924_v16 = vld [vmem:[%s2239_s17 + $0x10] sm:$0xff] }
 0xb37   :  { %795 = vmatpush.msra.mxu1 %v1380_v17  ;;  %v923_v17 = vld [vmem:[%s2239_s17 + $0x8] sm:$0xff] }
 0xb39   :  { %796 = vmatpush.msra.mxu1 %v1379_v18  ;;  %v922_v18 = vld [vmem:[%s2239_s17] sm:$0xff] }
 0xb3b   :  { %797 = vmatpush.msra.mxu1 %v1378_v19  ;;  %v1410_v19 = vld [vmem:[%s2243_s21 + $0x8] sm:$0xff] }
 0xb8f   :  { %v642_v53 = vpop.xlane.xlu2 %641 }
 0xb90   :  { %1499 = vrcp.f32 %v642_v53  ;;  %v654_v57 = vand.u32 2147483648, %v642_v53  ;;  %v652_v60 = vand.u32 2147483647, %v642_v53  ;;  %vm648_vm10 = vweird.f32 %v642_v53 }
 0xb92   :  { %v655_v62 = vor.u32 1.1754944e-38, %v654_v57  ;;  %vm653_vm12 = vcmp.eq.f32.partialorder %v652_v60, 8.507059e+37  ;;  %v1400_v57 = vld [vmem:[%s2237_s15 + $0xc0] sm:$0xff]  ;;  %v1397_v60 = vld [vmem:[%s2237_s15 + $0xa8] sm:$0xff] }
 0xb96   :  { %v1500_v54 = vpop.eup %1499 }
 0xb97   :  { %v644_v55 = vmul.f32 %v1500_v54, %v642_v53  ;;  %vm649_vm9 = vweird.f32 %v1500_v54  ;;  %v1404_v53 = vld [vmem:[%s2237_s15 + $0xe0] sm:$0xff] }
 0xb98   :  { %vm650_vm11 = vmor %vm648_vm10, %vm649_vm9  ;;  %904 = vmatpush.msrb.mxu0 %v1404_v53  ;;  %v996_v53 = vld [vmem:[%s2242_s20] sm:$0xff] }
 0xb99   :  { %v645_v56 = vsub.f32 1.0, %v644_v55  ;;  %v1402_v55 = vld [vmem:[%s2237_s15 + $0xd0] sm:$0xff] }
 0xb9a   :  { %v721_v58 = vpop.xlane.xlu0 %720 }
 0xb9b   :  { %v646_v59 = vmul.f32 %v1500_v54, %v645_v56  ;;  %1501 = vrcp.f32 %v721_v58  ;;  %v733_v6 = vand.u32 2147483648, %v721_v58  ;;  %v731_v9 = vand.u32 2147483647, %v721_v58  ;;  %v1401_v56 = vld [vmem:[%s2237_s15 + $0xc8] sm:$0xff] }
 0xb9c   :  { %vm727_vm14 = vweird.f32 %v721_v58 }
 0xb9d   :  { %v647_v61 = vadd.f32 %v1500_v54, %v646_v59  ;;  %v734_v7 = vor.u32 1.1754944e-38, %v733_v6  ;;  %vm732_vm2 = vcmp.eq.f32.partialorder %v731_v9, 8.507059e+37  ;;  %v1398_v59 = vld [vmem:[%s2237_s15 + $0xb0] sm:$0xff] }
 0xb9f   :  { %v651_v63 = vsel %vm650_vm11, %v1500_v54, %v647_v61  ;;  %v1403_v54 = vld [vmem:[%s2237_s15 + $0xd8] sm:$0xff]  ;;  %v1396_v61 = vld [vmem:[%s2237_s15 + $0xa0] sm:$0xff] }
 0xba0   :  { %v656_v0 = vsel %vm653_vm12, %v655_v62, %v651_v63  ;;  %905 = vmatpush.msrb.mxu0 %v1403_v54  ;;  %v1395_v62 = vld [vmem:[%s2237_s15 + $0x98] sm:$0xff]  ;;  %v1394_v63 = vld [vmem:[%s2237_s15 + $0x90] sm:$0xff]  ;;  %v1416_v54 = vld [vmem:[%s2242_s20 + $0x20] sm:$0xff] }
 0xba1   :  { %v1502_v1 = vpop.eup %1501  ;;  %v657_v3 = vmul.f32 %v1496_v45, %v656_v0  ;;  %v1393_v0 = vld [vmem:[%s2237_s15 + $0x88] sm:$0xff] }
 0xba2   :  { %v723_v4 = vmul.f32 %v1502_v1, %v721_v58  ;;  %vm728_vm13 = vweird.f32 %v1502_v1  ;;  %906 = vmatpush.msrb.mxu0 %v1402_v55  ;;  %v1399_v58 = vld [vmem:[%s2237_s15 + $0xb8] sm:$0xff] }
 0xba3   :  { %1374 = vmatmul.msk.f32.vlgmr.msrb.gmra.mxu1 %vm258_vm6, %v657_v3  ;;  %vm729_vm1 = vmor %vm727_vm14, %vm728_vm13  ;;  %v925_v3 = vld [vmem:[%s2239_s17 + $0x18] sm:$0xff] }
 0xba4   :  { %v724_v5 = vsub.f32 1.0, %v723_v4  ;;  %907 = vmatpush.msrb.mxu0 %v1401_v56  ;;  %941 = vmatpush.msrb.mxu1 %v925_v3  ;;  %v1471_v4 = vld [vmem:[%s2236_s14 + $0x1] ss:$0 sm:$0xff]  ;;  %v1421_v56 = vld [vmem:[%s2242_s20 + $0x38] sm:$0xff] }
 0xba6   :  { %v725_v8 = vmul.f32 %v1502_v1, %v724_v5  ;;  %908 = vmatpush.msrb.mxu0 %v1400_v57  ;;  %942 = vmatpush.msrb.mxu1 %v924_v16  ;;  %v1425_v57 = vld [vmem:[%s2242_s20 + $0x48] sm:$0xff] }
 0xba8   :  { %v726_v10 = vadd.f32 %v1502_v1, %v725_v8  ;;  %909 = vmatpush.msrb.mxu0 %v1399_v58  ;;  %943 = vmatpush.msrb.mxu1 %v923_v17  ;;  %v1429_v58 = vld [vmem:[%s2242_s20 + $0x58] sm:$0xff] }
 0xbaa   :  { %v730_v11 = vsel %vm729_vm1, %v1502_v1, %v726_v10  ;;  %910 = vmatpush.msrb.mxu0 %v1398_v59  ;;  %v1392_v1 = vld [vmem:[%s2237_s15 + $0x80] sm:$0xff]  ;;  %944 = vmatpush.msrb.mxu1 %v922_v18 }
 0xbab   :  { %v735_v12 = vsel %vm732_vm2, %v734_v7, %v730_v11 }
 0xbac   :  { %v736_v13 = vmul.f32 %v1498_v50, %v735_v12  ;;  %911 = vmatpush.msrb.mxu0 %v1397_v60  ;;  %v1420_v60 = vld [vmem:[%s2242_s20 + $0x30] sm:$0xff] }
 0xbae   :  { %1377 = vmatmul.msk.f32.vlgmr.msra.gmra.mxu0 %vm258_vm6, %v736_v13 }
 0xbaf   :  { %912 = vmatpush.msrb.mxu0 %v1396_v61  ;;  %v1424_v61 = vld [vmem:[%s2242_s20 + $0x40] sm:$0xff] }
 0xbb1   :  { %913 = vmatpush.msrb.mxu0 %v1395_v62  ;;  %v1428_v62 = vld [vmem:[%s2242_s20 + $0x50] sm:$0xff] }
 0xbb3   :  { %914 = vmatpush.msrb.mxu0 %v1394_v63 }
 0xbb5   :  { %915 = vmatpush.msrb.mxu0 %v1393_v0 }
 0xbb7   :  { %916 = vmatpush.msrb.mxu0 %v1392_v1 }
 0xc20   :  { %v681_v14 = vpop.f32.mrf.mxu1 }
 0xc21   :  { %684 = vst.msk [vmem:[#allocation2] sm:$0xff] %vm233_vm5, %v681_v14 }
 0xc2b   :  { %v760_v40 = vpop.f32.mrf.mxu0 }
 0xc2c   :  { %764 = vrot.lane.b32.xlu0 %v760_v40, %s2280_s3 }
 0xc9e   :  { %v765_v20 = vpop.permute.xlu0 %764 }
 0xc9f   :  { %767 = vst.msk [vmem:[#allocation2] sm:$0xff] %vm392_vm15, %v765_v20  ;;  %v1546_v20 = vmov 0  }
 0xca0   :  { %1453 = vset.pattern.permute.xlu2 %v1546_v20  ;;  %1454 = vset.pattern.permute.xlu1 %v1546_v20 }
 0xca1   :  { %1003 = vperm.xlu2 %1453, %v1410_v19   ;;  %1455 = vset.pattern.permute.xlu0 %v1546_v20 }
 0xca6   :  { %v768_v21 = vld [vmem:[#allocation2] sm:$0xff] }
 0xca7   :  { %1383 = vmatmul.msk.f32.vlgmr.msra.gmra.mxu1 %vm161_vm0, %v768_v21  ;;  %v1472_v21 = vld [vmem:[%s2238_s16 + $0x1] ss:$0 sm:$0xff] }
 0xd24   :  { %v799_v23 = vpop.f32.mrf.mxu1 }
 0xd25   :  { %v800_v24 = vadd.f32 %v1468_v22, %v799_v23 }
 0xd27   :  { %v2005_v25 = vadd.f32 %v800_v24, %v1938_v2  ;;  %v1388_v2 = vld [vmem:[%s2235_s13 + $0x30] sm:$0xff] }
 0xd28   :  { %863 = vmatpush.msra.mxu3 %v1388_v2 }
 0xd29   :  { %v807_v26 = vsel %vm161_vm0, %v2005_v25, 0.0 }
 0xd2a   :  { %808 = vadd.xlane.f32.xlu1 %v807_v26  ;;  %864 = vmatpush.msra.mxu3 %v1387_v33 }
 0xd2c   :  { %865 = vmatpush.msra.mxu3 %v1386_v34  ;;  %v2113_v34 = vpop.permute.xlu2 %1003 }
 0xd9d   :  { %v809_v27 = vpop.xlane.xlu1 %808 }
 0xd9e   :  { %v810_v28 = vmul.f32 %v809_v27, %v1786_v48 }
 0xda0   :  { %v811_v29 = vsub.f32 %v2005_v25, %v810_v28  ;;  %v1419_v28 = vld [vmem:[%s2243_s21 + $0x18] sm:$0xff] }
 0xda2   :  { %v812_v30 = vmul.f32 %v811_v29, %v811_v29 }
 0xda4   :  { %v813_v31 = vsel %vm161_vm0, %v812_v30, 0.0  ;;  %v1415_v30 = vld [vmem:[%s2243_s21 + $0x10] sm:$0xff] }
 0xda5   :  { %814 = vadd.xlane.f32.xlu0 %v813_v31  ;;  %1061 = vperm.xlu1 %1454, %v1415_v30  }
 0xdad   :  { %1131 = vperm.xlu1 %1454, %v1423_v32  }
 0xe18   :  { %v815_v38 = vpop.xlane.xlu0 %814 }
 0xe19   :  { %v816_v39 = vmul.f32 %v815_v38, %v1786_v48  ;;  %v1470_v48 = vld [vmem:[%s2234_s12 + $0x1] ss:$0 sm:$0xff] }
 0xe1a   :  { %v1439_v38 = vld [vmem:[%s2243_s21 + $0x40] sm:$0xff] }
 0xe1b   :  { %v817_v41 = vadd.f32 1e-06, %v816_v39  ;;  %v989_v39 = vld [vmem:[%s2243_s21] sm:$0xff]  ;;  %1274 = vperm.xlu1 %1454, %v1439_v38  }
 0xe1c   :  { %992 = vperm.xlu0 %1455, %v989_v39  }
 0xe1d   :  { %1503 = vrsqrt.f32 %v817_v41  ;;  %vm824_vm15 = vweird.f32 %v817_v41 }
 0xe23   :  { %v1504_v42 = vpop.eup %1503 }
 0xe24   :  { %v819_v43 = vmul.f32 %v1504_v42, %v817_v41  ;;  %vm825_vm6 = vweird.f32 %v1504_v42 }
 0xe25   :  { %vm826_vm3 = vmor %vm824_vm15, %vm825_vm6 }
 0xe26   :  { %v820_v44 = vmul.f32 %v1504_v42, %v819_v43 }
 0xe28   :  { %v821_v45 = vmul.f32 0.5, %v820_v44 }
 0xe2a   :  { %v822_v46 = vsub.f32 1.5, %v821_v45  ;;  %v1427_v45 = vld [vmem:[%s2243_s21 + $0x28] sm:$0xff] }
 0xe2c   :  { %v823_v47 = vmul.f32 %v1504_v42, %v822_v46  ;;  %v1431_v46 = vld [vmem:[%s2243_s21 + $0x30] sm:$0xff] }
 0xe2e   :  { %v827_v15 = vsel %vm826_vm3, %v1504_v42, %v823_v47  ;;  %v1435_v47 = vld [vmem:[%s2243_s21 + $0x38] sm:$0xff] }
 0xe2f   :  { %v828_v50 = vmul.f32 %v827_v15, %v811_v29  ;;  %v1547_v29 = vmov 16.0   ;;  %v1412_v15 = vld [vmem:[%s2242_s20 + $0x18] sm:$0xff] }
 0xe30   :  { %1027 = vmatpush.msrb.mxu3 %v1412_v15 }
 0xe31   :  { %v832_v51 = vmul.f32 %v1469_v49, %v828_v50  ;;  %v997_v50 = vld [vmem:[%s2242_s20 + $0x8] sm:$0xff] }
 0xe32   :  { %1050 = vmatpush.msra.mxu1 %v997_v50 }
 0xe33   :  { %v836_v52 = vadd.f32 %v1470_v48, %v832_v51  ;;  %v1417_v48 = vld [vmem:[%s2242_s20 + $0x28] sm:$0xff] }
 0xe34   :  { %1085 = vmatpush.msra.mxu2 %v1417_v48  ;;  %1051 = vmatpush.msra.mxu1 %v996_v53 }
 0xe35   :  { %1391 = vmatmul.msk.f32.vlgmr.msra.gmra.mxu3 %vm161_vm0, %v836_v52  ;;  %v1411_v52 = vld [vmem:[%s2242_s20 + $0x10] sm:$0xff] }
 0xe36   :  { %1028 = vmatpush.msrb.mxu3 %v1411_v52  ;;  %1086 = vmatpush.msra.mxu2 %v1416_v54 }
 0xe38   :  { %1120 = vmatpush.msra.mxu3 %v1421_v56  ;;  %1191 = vmatpush.msrb.mxu2 %v1429_v58 }
 0xe3a   :  { %1121 = vmatpush.msra.mxu3 %v1420_v60  ;;  %1192 = vmatpush.msrb.mxu2 %v1428_v62 }
 0xeb8   :  { %v867_v5 = vpop.f32.mrf.mxu3 }
 0xeb9   :  { %v868_v6 = vadd.f32 %v1471_v4, %v867_v5 }
 0xebb   :  { %v870_v8 = vmul.f32 %v868_v6, %v868_v6 }
 0xebd   :  { %v871_v9 = vmul.f32 %v870_v8, %v868_v6 }
 0xebf   :  { %v872_v10 = vmul.f32 0.044715, %v871_v9  ;;  %v1474_v9 = vld [vmem:[%s2241_s19] ss:$0 sm:$0xff] }
 0xec1   :  { %v873_v7 = vadd.f32 %v872_v10, %v868_v6 }
 0xec3   :  { %v874_v11 = vmul.f32 0.7978846, %v873_v7  ;;  %v1062_v7 = vpop.permute.xlu1 %1061 }
 0xec5   :  { %1505 = vtanh.f32 %v874_v11 }
 0xec6   :  { %1507 = vrcp.f32 %v1547_v29  ;;  %v1440_v29 = vld [vmem:[%s2242_s20 + $0x80] sm:$0xff] }
 0xecb   :  { %v1506_v12 = vpop.eup %1505 }
 0xecc   :  { %v876_v13 = vadd.f32 1.0, %v1506_v12  ;;  %v1508_v31 = vpop.eup %1507 }
 0xece   :  { %v877_v14 = vmul.f32 0.5, %v876_v13 }
 0xed0   :  { %v878_v40 = vmul.f32 %v877_v14, %v868_v6  ;;  %v1473_v6 = vld [vmem:[%s2240_s18] ss:$0 sm:$0xff] }
 0xed2   :  { %917 = vmatmul.f32.vlgmr.msrb.gmra.mxu0 %v878_v40  ;;  %v993_v40 = vpop.permute.xlu0 %992 }
 0xf4f   :  { %v918_v22 = vpop.f32.mrf.mxu0 }
 0xf50   :  { %v919_v23 = vadd.f32 %v1472_v21, %v918_v22  ;;  %v1433_v21 = vld [vmem:[%s2242_s20 + $0x68] sm:$0xff]  ;;  %v1437_v22 = vld [vmem:[%s2242_s20 + $0x78] sm:$0xff] }
 0xf52   :  { %v921_v24 = vadd.f32 %v919_v23, %v2005_v25  ;;  %v955_v25 = vmul.f32 16.0, %v1508_v31  ;;  %v1441_v23 = vld [vmem:[%s2242_s20 + $0x88] sm:$0xff] }
 0xf54   :  { %1409 = vmatmul.msk.f32.vlgmr.msrb.gmra.mxu1 %vm161_vm0, %v921_v24  ;;  %v956_v2 = vsub.f32 1.0, %v955_v25  ;;  %vm959_vm0 = vweird.f32 %v1508_v31  ;;  %v1132_v24 = vpop.permute.xlu1 %1131 }
 0xf55   :  { %1155 = vmatpush.msrb.mxu1 %v1425_v57 }
 0xf56   :  { %v957_v33 = vmul.f32 %v1508_v31, %v956_v2 }
 0xf57   :  { %1156 = vmatpush.msrb.mxu1 %v1424_v61 }
 0xf58   :  { %v958_v35 = vadd.f32 %v1508_v31, %v957_v33 }
 0xf5a   :  { %v2115_v36 = vsel %vm959_vm0, %v1508_v31, %v958_v35 }
 0xfd1   :  { %v946_v26 = vpop.f32.mrf.mxu1 }
 0xfd2   :  { %v951_v27 = vsel %vm233_vm5, %v946_v26, 0.0 }
 0xfd3   :  { %952 = vadd.xlane.f32.xlu2 %v951_v27  ;;  %v1436_v27 = vld [vmem:[%s2242_s20 + $0x70] sm:$0xff] }
 0xfeb   :  { %1096 = vperm.xlu2 %1453, %v1419_v28  }
0x1046   :  { %v953_v37 = vpop.xlane.xlu2 %952 }
0x1047   :  { %v961_v41 = vmul.f32 %v2115_v36, %v953_v37 }
0x1049   :  { %v962_v42 = vsub.f32 %v946_v26, %v961_v41  ;;  %v1432_v26 = vld [vmem:[%s2242_s20 + $0x60] sm:$0xff] }
0x104b   :  { %v963_v43 = vmul.f32 %v962_v42, %v962_v42 }
0x104d   :  { %v964_v44 = vsel %vm233_vm5, %v963_v43, 0.0 }
0x104e   :  { %965 = vadd.xlane.f32.xlu2 %v964_v44  ;;  %v2134_v49 = vpop.permute.xlu2 %1096 }
0x1066   :  { %1167 = vperm.xlu2 %1453, %v1427_v45  }
0x106e   :  { %1202 = vperm.xlu2 %1453, %v1431_v46  }
0x1076   :  { %1238 = vperm.xlu2 %1453, %v1435_v47  }
0x10c1   :  { %v966_v51 = vpop.xlane.xlu2 %965 }
0x10c2   :  { %v967_v55 = vmul.f32 %v966_v51, %v2115_v36 }
0x10c4   :  { %v968_v59 = vadd.f32 1e-06, %v967_v55 }
0x10c6   :  { %1509 = vrsqrt.f32 %v968_v59  ;;  %vm975_vm7 = vweird.f32 %v968_v59 }
0x10c9   :  { %v1168_v13 = vpop.permute.xlu2 %1167 }
0x10cc   :  { %v1510_v63 = vpop.eup %1509 }
0x10cd   :  { %v970_v0 = vmul.f32 %v1510_v63, %v968_v59  ;;  %vm976_vm4 = vweird.f32 %v1510_v63 }
0x10ce   :  { %vm977_vm8 = vmor %vm975_vm7, %vm976_vm4 }
0x10cf   :  { %v971_v1 = vmul.f32 %v1510_v63, %v970_v0 }
0x10d1   :  { %v972_v3 = vmul.f32 0.5, %v971_v1  ;;  %v1203_v30 = vpop.permute.xlu2 %1202 }
0x10d3   :  { %v973_v4 = vsub.f32 1.5, %v972_v3 }
0x10d5   :  { %v974_v5 = vmul.f32 %v1510_v63, %v973_v4 }
0x10d7   :  { %v978_v8 = vsel %vm977_vm8, %v1510_v63, %v974_v5 }
0x10d8   :  { %v979_v10 = vmul.f32 %v978_v8, %v962_v42 }
0x10d9   :  { %v1239_v35 = vpop.permute.xlu2 %1238 }
0x10da   :  { %v983_v11 = vmul.f32 %v1473_v6, %v979_v10  ;;  %v1475_v10 = vld [vmem:[%s2244_s22] ss:$0 sm:$0xff] }
0x10dc   :  { %v987_v12 = vadd.f32 %v1474_v9, %v983_v11 }
0x10de   :  { %v1056_v14 = vrot.slane %v987_v12, 7  ;;  %v988_v16 = vrot.slane %v987_v12, 5  ;;  %v998_v17 = vrot.slane %v987_v12, 6  ;;  %v1162_v28 = vrot.slane %v987_v12, 1 }
0x10df   :  { %v1134_v32 = vmul.f32 %v1132_v24, %v987_v12  ;;  %v1269_v2 = vrot.slane %v987_v12, 3  ;;  %v1233_v33 = vrot.slane %v987_v12, 2 }
0x10e0   :  { %v1064_v18 = vmul.f32 %v1062_v7, %v1056_v14  ;;  %v995_v19 = vmul.f32 %v993_v40, %v988_v16  ;;  %v1006_v20 = vmul.f32 %v2113_v34, %v998_v17  ;;  %v1170_v31 = vmul.f32 %v1168_v13, %v1162_v28  ;;  %v1275_v34 = vpop.permute.xlu1 %1274 }
0x10e1   :  { %v1099_v25 = vmul.f32 %v2134_v49, %v1056_v14  ;;  %v1277_v37 = vmul.f32 %v1275_v34, %v1269_v2  ;;  %v1205_v38 = vmul.f32 %v1203_v30, %v1162_v28  ;;  %v1241_v39 = vmul.f32 %v1239_v35, %v1233_v33 }
0x10e2   :  { %1418 = vmatmul.msk.f32.vlgmr.msra.gmra.mxu2 %vm233_vm5, %v1064_v18  ;;  %1413 = vmatmul.msk.f32.vlgmr.msrb.gmra.mxu3 %vm233_vm5, %v1006_v20 }
0x10e3   :  { %1414 = vmatmul.msk.f32.vlgmr.msra.gmra.mxu1 %vm233_vm5, %v995_v19  ;;  %1226 = vmatpush.msrb.mxu3 %v1433_v21 }
0x10e4   :  { %1262 = vmatpush.msra.mxu1 %v1437_v22  ;;  %1298 = vmatpush.msra.mxu2 %v1441_v23 }
0x10e5   :  { %1227 = vmatpush.msrb.mxu3 %v1432_v26 }
0x10e6   :  { %1263 = vmatpush.msra.mxu1 %v1436_v27  ;;  %1299 = vmatpush.msra.mxu2 %v1440_v29 }
0x10ea   :  { %1430 = vmatmul.msk.f32.vlgmr.msrb.gmra.mxu2 %vm233_vm5, %v1170_v31  ;;  %1422 = vmatmul.msk.f32.vlgmr.msra.gmra.mxu3 %vm233_vm5, %v1099_v25 }
0x10eb   :  { %1426 = vmatmul.msk.f32.vlgmr.msrb.gmra.mxu1 %vm233_vm5, %v1134_v32 }
0x10f2   :  { %1442 = vmatmul.msk.f32.vlgmr.msra.gmra.mxu2 %vm233_vm5, %v1277_v37  ;;  %1434 = vmatmul.msk.f32.vlgmr.msrb.gmra.mxu3 %vm233_vm5, %v1205_v38 }
0x10f3   :  { %1438 = vmatmul.msk.f32.vlgmr.msra.gmra.mxu1 %vm233_vm5, %v1241_v39 }
0x1160   :  { %v1053_v41 = vpop.f32.mrf.mxu1 }
0x1165   :  { %v1030_v42 = vpop.f32.mrf.mxu3  ;;  %v1088_v43 = vpop.f32.mrf.mxu2 }
0x1166   :  { %v1054_v44 = vadd.f32 %v1053_v41, %v1030_v42 }
0x1168   :  { %v1091_v45 = vadd.f32 %v1088_v43, %v1054_v44  ;;  %v1158_v46 = vpop.f32.mrf.mxu1 }
0x116d   :  { %v1123_v47 = vpop.f32.mrf.mxu3  ;;  %v1194_v15 = vpop.f32.mrf.mxu2 }
0x116e   :  { %v1126_v49 = vadd.f32 %v1123_v47, %v1091_v45 }
0x1170   :  { %v1161_v50 = vadd.f32 %v1158_v46, %v1126_v49  ;;  %v1265_v53 = vpop.f32.mrf.mxu1 }
0x1172   :  { %v1197_v48 = vadd.f32 %v1194_v15, %v1161_v50 }
0x1175   :  { %v1229_v51 = vpop.f32.mrf.mxu3  ;;  %v1301_v55 = vpop.f32.mrf.mxu2 }
0x1176   :  { %v1232_v52 = vadd.f32 %v1229_v51, %v1197_v48 }
0x1178   :  { %v1268_v54 = vadd.f32 %v1265_v53, %v1232_v52 }
0x117a   :  { %v1304_v56 = vadd.f32 %v1301_v55, %v1268_v54 }
0x117c   :  { %v1307_v57 = vsel %vm233_vm5, %v1304_v56, 0.0 }
0x117d   :  { %1308 = vadd.xlane.f32.xlu1 %v1307_v57 }
0x11f0   :  { %v1309_v58 = vpop.xlane.xlu1 %1308 }
0x11f1   :  { %v1310_v59 = vmul.f32 %v1309_v58, %v2115_v36 }
0x11f3   :  { %v1311_v60 = vsub.f32 %v1304_v56, %v1310_v59 }
0x11f5   :  { %v1312_v61 = vmul.f32 %v1311_v60, %v1311_v60 }
0x11f7   :  { %v1313_v62 = vsel %vm233_vm5, %v1312_v61, 0.0 }
0x11f8   :  { %1314 = vadd.xlane.f32.xlu2 %v1313_v62 }
0x126b   :  { %v1315_v63 = vpop.xlane.xlu2 %1314 }
0x126c   :  { %v1316_v0 = vmul.f32 %v1315_v63, %v2115_v36  ;;  %v1476_v36 = vld [vmem:[%s2245_s23] ss:$0 sm:$0xff] }
0x126e   :  { %v1317_v1 = vadd.f32 1e-06, %v1316_v0 }
0x1270   :  { %1511 = vrsqrt.f32 %v1317_v1  ;;  %vm1324_vm10 = vweird.f32 %v1317_v1 }
0x1276   :  { %v1512_v3 = vpop.eup %1511 }
0x1277   :  { %v1319_v4 = vmul.f32 %v1512_v3, %v1317_v1  ;;  %vm1325_vm9 = vweird.f32 %v1512_v3 }
0x1278   :  { %vm1326_vm11 = vmor %vm1324_vm10, %vm1325_vm9 }
0x1279   :  { %v1320_v5 = vmul.f32 %v1512_v3, %v1319_v4 }
0x127b   :  { %v1321_v6 = vmul.f32 0.5, %v1320_v5 }
0x127d   :  { %v1322_v8 = vsub.f32 1.5, %v1321_v6 }
0x127f   :  { %v1323_v9 = vmul.f32 %v1512_v3, %v1322_v8 }
0x1281   :  { %v1327_v7 = vsel %vm1326_vm11, %v1512_v3, %v1323_v9 }
0x1282   :  { %v1328_v11 = vmul.f32 %v1327_v7, %v1311_v60 }
0x1284   :  { %v1332_v12 = vmul.f32 %v1475_v10, %v1328_v11 }
0x1286   :  { %v1336_v13 = vadd.f32 %v1476_v36, %v1332_v12 }
0x1288   :  { %v1337_v14 = vsel %vm233_vm5, %v1336_v13, 0.0 }
0x1289   :  { %1338 = vst [vmem:[#allocation3] sm:$0xff] %v1337_v14 }
0x128a   :  { %1349 = dma.vmem_to_hbm [thread:$0]  %s1345_s11, 128, %s1347_s7, [#allocation4]  }
0x128b   :  { %1537 = dma.done.wait [#allocation4], 128  }
0x128c   :  { %1538 = vsyncadd [#allocation4], 4294967168 }
0x128d   :  { %1354 = vsyncpa [#allocation4], 1 }

</bundles_post_ra>
